<compile_context>
chip_gen: v7x
topology: tpu7x:2x2x1
jax: 0.10.0
libtpu: 0.0.40
codegen_flags: <defaults>
</compile_context>

<pallas_src>
import jax
import jax.numpy as jnp
from jax.experimental import pallas as pl
from jax.experimental.pallas import tpu as pltpu


BLOCK_B = 8     # images per grid step; must be a multiple of 8 (sublane divisibility)


# ----------------------------- fused Pallas kernel -----------------------------

def _mnist_fused_kernel(lhs_ref, k1_ref, b1_ref, s2_ref, k2_ref, b2_ref,
                        s3_ref, m1_ref, bfc1_ref, wfc2_ref, bfc2_ref, o_ref):
    f32 = jnp.float32
    bf16 = jnp.bfloat16

    # ---- conv1 (1->16, k=8, s=2, p=2) + tanh: ONE GEMM, M = B*13, K = 224 ------
    a1 = jnp.tanh(jnp.dot(lhs_ref[...], k1_ref[...],
                          preferred_element_type=f32) + b1_ref[...])      # (B*13, 208) f32

    # ---- maxpool 2x2 stride 1 (fused shifted max on the stacked rows) ----------
    hp1 = jnp.maximum(a1[:-1, :], a1[1:, :])                              # (B*13-1, 208)
    p1 = jnp.maximum(hp1[:, 0:207], hp1[:, 1:208]).astype(bf16)           # (B*13-1, 207)

    # ---- conv2 (16->32, k=4, s=2, p=0) + tanh ----------------------------------
    # Per kh tap: a block-diagonal 0/1 selection GEMM gathers rows b*13 + 2*oh2 + kh,
    # then one weight GEMM contracts the 16 input channels and kw (K = 207).
    acc2 = None
    for kh in range(4):
        g = jnp.dot(s2_ref[kh], p1, preferred_element_type=f32).astype(bf16)   # (B*5, 207)
        t = jnp.dot(g, k2_ref[kh], preferred_element_type=f32)                 # (B*5, 160)
        acc2 = t if acc2 is None else acc2 + t
    a2 = jnp.tanh(acc2 + b2_ref[...])                                     # (B*5, 160) f32

    # ---- maxpool 2x2 stride 1 ---------------------------------------------------
    hp2 = jnp.maximum(a2[:-1, :], a2[1:, :])                              # (B*5-1, 160)
    p2 = jnp.maximum(hp2[:, 0:159], hp2[:, 1:160]).astype(bf16)           # (B*5-1, 159)

    # ---- fc1 (torch NCHW flatten folded into M1) + tanh ------------------------
    facc = None
    for h2 in range(4):
        q = jnp.dot(s3_ref[h2], p2, preferred_element_type=f32).astype(bf16)   # (B, 159)
        t = jnp.dot(q, m1_ref[h2], preferred_element_type=f32)                 # (B, 32)
        facc = t if facc is None else facc + t
    hfc = jnp.tanh(facc + bfc1_ref[...]).astype(bf16)                     # (B, 32)

    # ---- fc2: one (B, 10) store per grid step -----------------------------------
    o_ref[...] = jnp.dot(hfc, wfc2_ref[...], preferred_element_type=f32) + bfc2_ref[...]


# ------------------------- one-time weight repacking ---------------------------

def prepare_params(params, block_b=BLOCK_B):
    """Repack torch-layout weights into the constant MXU operands of the fused kernel.
    Done once (outside the per-forward path). The selection matrices depend on the
    per-step batch block size `block_b`."""
    assert block_b % 8 == 0, "block_b must be a multiple of 8"
    f32, bf16 = jnp.float32, jnp.bfloat16
    B = block_b
    w1 = params["w_conv1"].astype(f32)        # (16, 1, 8, 8)
    b1 = params["b_conv1"].astype(f32)        # (16,)
    w2 = params["w_conv2"].astype(f32)        # (32, 16, 4, 4)
    b2 = params["b_conv2"].astype(f32)        # (32,)
    wfc1 = params["w_fc1"].astype(f32)        # (32, 512)  torch (out, in)
    bfc1 = params["b_fc1"].astype(f32)        # (32,)
    wfc2 = params["w_fc2"].astype(f32)        # (10, 32)
    bfc2 = params["b_fc2"].astype(f32)        # (10,)

    # conv1: K1[kh*28+s, f*13+ow] = w1[f,0,kh,(s+2)-2*ow]   (zero where kw outside [0,8))
    s = jnp.arange(28)
    ow = jnp.arange(13)
    kw = (s[:, None] + 2) - 2 * ow[None, :]                   # (28, 13)
    valid = (kw >= 0) & (kw < 8)
    k1 = w1[:, 0][:, :, jnp.clip(kw, 0, 7)]                   # (16, 8, 28, 13) [f,kh,s,ow]
    k1 = jnp.where(valid[None, None], k1, 0.0)
    k1 = jnp.transpose(k1, (1, 2, 0, 3)).reshape(224, 208)    # rows [kh,s], cols [f,ow]
    b1rep = jnp.repeat(b1, 13).reshape(1, 208)

    # conv2: K2[kh][c*13+w, g*5+ow2] = w2[g,c,kh,w-2*ow2]    (zero where kw outside [0,4))
    w = jnp.arange(13)
    ow2 = jnp.arange(5)
    kw2 = w[:, None] - 2 * ow2[None, :]                       # (13, 5)
    valid2 = (kw2 >= 0) & (kw2 < 4)
    k2 = w2[:, :, :, jnp.clip(kw2, 0, 3)]                     # (32, 16, 4, 13, 5)
    k2 = jnp.where(valid2[None, None, None], k2, 0.0)
    k2 = jnp.transpose(k2, (2, 1, 3, 0, 4)).reshape(4, 208, 160)[:, :207, :]
    b2rep = jnp.repeat(b2, 5).reshape(1, 160)

    # conv2 H gather: S2[kh][b*5+oh2, b*13 + 2*oh2 + kh] = 1  (block-diag over B images)
    bi = jnp.arange(B)
    oh2v = jnp.arange(5)
    khv = jnp.arange(4)
    rsel = bi[None, :, None] * 13 + 2 * oh2v[None, None, :] + khv[:, None, None]  # (4,B,5)
    cols = jnp.arange(B * 13 - 1)
    s2 = (cols[None, None, None, :] == rsel[..., None]).reshape(4, B * 5, B * 13 - 1)

    # fc1 with the torch NCHW flatten (d = g*16 + h2*4 + w2) folded in:
    #   M1[h2][g*5+w2, j] = wfc1[j, g*16 + h2*4 + w2]   (w2 <= 3, zero pool-pad column)
    g = jnp.arange(32)
    w2i = jnp.arange(5)
    h2 = jnp.arange(4)
    d = g[None, :, None] * 16 + h2[:, None, None] * 4 + jnp.minimum(w2i, 3)[None, None, :]
    m1 = wfc1[:, d]                                           # (32, 4, 32, 5) [j,h2,g,w2]
    m1 = jnp.where((w2i <= 3)[None, None, None, :], m1, 0.0)
    m1 = jnp.transpose(m1, (1, 2, 3, 0)).reshape(4, 160, 32)[:, :159, :]

    # fc1 H gather: S3[h2][b, b*5 + h2] = 1
    rsel3 = bi[None, :] * 5 + h2[:, None]                     # (4, B)
    cols3 = jnp.arange(B * 5 - 1)
    s3 = (cols3[None, None, :] == rsel3[..., None])           # (4, B, B*5-1)

    # FRAGILE INVARIANT check: contaminated W-pool columns must hit all-zero weight rows.
    assert bool(jnp.all(k2[:, 12::13, :] == 0.0)), "conv2 pool-pad columns not neutralized"
    assert bool(jnp.all(m1[:, 4::5, :] == 0.0)), "fc1 pool-pad columns not neutralized"

    return {
        "k1": k1.astype(bf16), "b1": b1rep,
        "s2": s2.astype(bf16), "k2": k2.astype(bf16), "b2": b2rep,
        "s3": s3.astype(bf16), "m1": m1.astype(bf16),
        "bfc1": bfc1.reshape(1, 32),
        "wfc2": wfc2.T.astype(bf16), "bfc2": bfc2.reshape(1, 10),
    }


# ------------------------------- forward wrapper --------------------------------

def mnist_cnn_forward(x, prep, block_b=BLOCK_B):
    """x: (N, 1, 28, 28) float32 -> logits (N, 10). in_channels == 1 -> norm is Identity."""
    B = block_b
    assert prep["s3"].shape[1] == B, "prep was built for a different per-step block size"
    N = x.shape[0]
    npad = ((N + B - 1) // B) * B

    # Layout plumbing in the wrapper (cheap; makes the input DMA one contiguous lane-dense
    # slab): pad H by 2 and gather the 8 kh rows per conv1 output row -> (N*13, 224) bf16.
    imgs = x.reshape(N, 28, 28)
    if npad != N:
        imgs = jnp.pad(imgs, ((0, npad - N), (0, 0), (0, 0)))
    xp = jnp.pad(imgs, ((0, 0), (2, 2), (0, 0)))                        # (npad, 32, 28)
    rows = 2 * jnp.arange(13)[:, None] + jnp.arange(8)[None, :]         # (13, 8), in [0,32)
    lhs1 = xp[:, rows, :].reshape(npad * 13, 8 * 28).astype(jnp.bfloat16)

    out = pl.pallas_call(
        _mnist_fused_kernel,
        out_shape=jax.ShapeDtypeStruct((npad, 10), jnp.float32),
        grid=(npad // B,),
        in_specs=[
            pl.BlockSpec((B * 13, 224), lambda i: (i, 0)),               # conv1 im2col slab
            pl.BlockSpec((224, 208), lambda i: (0, 0)),                  # K1
            pl.BlockSpec((1, 208), lambda i: (0, 0)),                    # conv1 bias
            pl.BlockSpec((4, B * 5, B * 13 - 1), lambda i: (0, 0, 0)),   # S2 row gather
            pl.BlockSpec((4, 207, 160), lambda i: (0, 0, 0)),            # K2
            pl.BlockSpec((1, 160), lambda i: (0, 0)),                    # conv2 bias
            pl.BlockSpec((4, B, B * 5 - 1), lambda i: (0, 0, 0)),        # S3 row gather
            pl.BlockSpec((4, 159, 32), lambda i: (0, 0, 0)),             # fc1 (flatten folded)
            pl.BlockSpec((1, 32), lambda i: (0, 0)),                     # fc1 bias
            pl.BlockSpec((32, 10), lambda i: (0, 0)),                    # fc2 weight^T
            pl.BlockSpec((1, 10), lambda i: (0, 0)),                     # fc2 bias
        ],
        out_specs=pl.BlockSpec((B, 10), lambda i: (i, 0)),
        compiler_params=pltpu.CompilerParams(
            dimension_semantics=("parallel",)),
    )(lhs1, prep["k1"], prep["b1"], prep["s2"], prep["k2"], prep["b2"],
      prep["s3"], prep["m1"], prep["bfc1"], prep["wfc2"], prep["bfc2"])
    return out[:N]


# ------------------------- pure-JAX reference (checking) ------------------------

def mnist_cnn_reference(x, params):
    def conv(x, w, b, stride, pad):
        y = jax.lax.conv_general_dilated(
            x, w, window_strides=(stride, stride),
            padding=((pad, pad), (pad, pad)),
            dimension_numbers=("NCHW", "OIHW", "NCHW"))
        return y + b[None, :, None, None]

    def pool(x):
        return jax.lax.reduce_window(x, -jnp.inf, jax.lax.max,
                                     (1, 1, 2, 2), (1, 1, 1, 1), "VALID")

    h = pool(jnp.tanh(conv(x, params["w_conv1"], params["b_conv1"], 2, 2)))
    h = pool(jnp.tanh(conv(h, params["w_conv2"], params["b_conv2"], 2, 0)))
    h = h.reshape(h.shape[0], -1)                         # torch NCHW flatten
    h = jnp.tanh(h @ params["w_fc1"].T + params["b_fc1"])
    return h @ params["w_fc2"].T + params["b_fc2"]


# ----------------------------------- init ----------------------------------------

def init_params(key):
    ks = jax.random.split(key, 8)

    def u(k, shape, fan_in):
        bound = 1.0 / jnp.sqrt(jnp.float32(fan_in))
        return jax.random.uniform(k, shape, jnp.float32, -bound, bound)

    return {
        "w_conv1": u(ks[0], (16, 1, 8, 8), 1 * 8 * 8),
        "b_conv1": u(ks[1], (16,), 1 * 8 * 8),
        "w_conv2": u(ks[2], (32, 16, 4, 4), 16 * 4 * 4),
        "b_conv2": u(ks[3], (32,), 16 * 4 * 4),
        "w_fc1":   u(ks[4], (32, 32 * 4 * 4), 32 * 4 * 4),   # torch Linear: (out, in)
        "b_fc1":   u(ks[5], (32,), 32 * 4 * 4),
        "w_fc2":   u(ks[6], (10, 32), 32),
        "b_fc2":   u(ks[7], (10,), 32),
    }


if __name__ == "__main__":
    key = jax.random.PRNGKey(0)
    pkey, xkey = jax.random.split(key)
    params = init_params(pkey)
    prep = prepare_params(params, block_b=BLOCK_B)   # one-time weight repack

    # in_channels=1 path: Linear(32*4*4, 32) pins the input to 28x28 (MNIST).
    # N=16 with BLOCK_B=8 -> grid length 2 (even, so both v7x TensorCores are used).
    x = jax.random.normal(xkey, (16, 1, 28, 28), jnp.float32)

    out = jax.jit(mnist_cnn_forward)(x, prep)
    jax.block_until_ready(out)
    assert out.shape == (16, 10) and out.dtype == jnp.float32

    ref = mnist_cnn_reference(x, params)
    err = jnp.max(jnp.abs(out - ref))
    assert jnp.allclose(out, ref, atol=2e-2, rtol=2e-2), f"max abs diff {err}"
    print("KERNEL_OK")
</pallas_src>

<mosaic_0001>
module attributes {stable_mosaic.version = 11 : i64} {
  func.func @_mnist_fused_kernel(%arg0: i32, %arg1: memref<104x224xbf16, #tpu.memory_space<vmem>>, %arg2: memref<224x208xbf16, #tpu.memory_space<vmem>>, %arg3: memref<1x208xf32, #tpu.memory_space<vmem>>, %arg4: memref<4x40x103xbf16, #tpu.memory_space<vmem>>, %arg5: memref<4x207x160xbf16, #tpu.memory_space<vmem>>, %arg6: memref<1x160xf32, #tpu.memory_space<vmem>>, %arg7: memref<4x8x39xbf16, #tpu.memory_space<vmem>>, %arg8: memref<4x159x32xbf16, #tpu.memory_space<vmem>>, %arg9: memref<1x32xf32, #tpu.memory_space<vmem>>, %arg10: memref<32x10xbf16, #tpu.memory_space<vmem>>, %arg11: memref<1x10xf32, #tpu.memory_space<vmem>>, %arg12: memref<8x10xf32, #tpu.memory_space<vmem>>) attributes {dimension_semantics = [#tpu.dimension_semantics<parallel>], iteration_bounds = array<i64: 2>, scalar_prefetch = 0 : i64, scratch_operands = 0 : i64, tpu.core_type = #tpu.core_type<tc>, window_params = [{transform_indices = @transform_0, window_bounds = array<i64: 104, 224>}, {pipeline_mode = #tpu.pipeline_mode<synchronous>, transform_indices = @transform_1, window_bounds = array<i64: 224, 208>}, {pipeline_mode = #tpu.pipeline_mode<synchronous>, transform_indices = @transform_2, window_bounds = array<i64: 1, 208>}, {pipeline_mode = #tpu.pipeline_mode<synchronous>, transform_indices = @transform_3, window_bounds = array<i64: 4, 40, 103>}, {pipeline_mode = #tpu.pipeline_mode<synchronous>, transform_indices = @transform_4, window_bounds = array<i64: 4, 207, 160>}, {pipeline_mode = #tpu.pipeline_mode<synchronous>, transform_indices = @transform_5, window_bounds = array<i64: 1, 160>}, {pipeline_mode = #tpu.pipeline_mode<synchronous>, transform_indices = @transform_6, window_bounds = array<i64: 4, 8, 39>}, {pipeline_mode = #tpu.pipeline_mode<synchronous>, transform_indices = @transform_7, window_bounds = array<i64: 4, 159, 32>}, {pipeline_mode = #tpu.pipeline_mode<synchronous>, transform_indices = @transform_8, window_bounds = array<i64: 1, 32>}, {pipeline_mode = #tpu.pipeline_mode<synchronous>, transform_indices = @transform_9, window_bounds = array<i64: 32, 10>}, {pipeline_mode = #tpu.pipeline_mode<synchronous>, transform_indices = @transform_10, window_bounds = array<i64: 1, 10>}, {transform_indices = @transform_11, window_bounds = array<i64: 8, 10>}]} {
    %c0 = arith.constant 0 : index
    %c0_0 = arith.constant 0 : index
    %0 = vector.load %arg1[%c0, %c0_0] : memref<104x224xbf16, #tpu.memory_space<vmem>>, vector<104x224xbf16>
    %c0_1 = arith.constant 0 : index
    %c0_2 = arith.constant 0 : index
    %1 = vector.load %arg2[%c0_1, %c0_2] : memref<224x208xbf16, #tpu.memory_space<vmem>>, vector<224x208xbf16>
    %cst = arith.constant dense<0.000000e+00> : vector<104x208xf32>
    %2 = tpu.matmul %0, %1, %cst {dimension_numbers = #tpu.dot_dimension_numbers<[1], [0], [0], [1], [0, 0, 1, 1], [], []>} : vector<104x224xbf16>, vector<224x208xbf16>, vector<104x208xf32> -> vector<104x208xf32>
    %c0_3 = arith.constant 0 : index
    %c0_4 = arith.constant 0 : index
    %3 = vector.load %arg3[%c0_3, %c0_4] : memref<1x208xf32, #tpu.memory_space<vmem>>, vector<1x208xf32>
    %4 = vector.broadcast %3 : vector<1x208xf32> to vector<104x208xf32>
    %5 = arith.addf %2, %4 : vector<104x208xf32>
    %6 = math.tanh %5 : vector<104x208xf32>
    %7 = vector.extract_strided_slice %6 {offsets = [0, 0], sizes = [103, 208], strides = [1, 1]} : vector<104x208xf32> to vector<103x208xf32>
    %8 = vector.extract_strided_slice %6 {offsets = [1, 0], sizes = [103, 208], strides = [1, 1]} : vector<104x208xf32> to vector<103x208xf32>
    %9 = arith.maximumf %7, %8 : vector<103x208xf32>
    %10 = vector.extract_strided_slice %9 {offsets = [0, 0], sizes = [103, 207], strides = [1, 1]} : vector<103x208xf32> to vector<103x207xf32>
    %11 = vector.extract_strided_slice %9 {offsets = [0, 1], sizes = [103, 207], strides = [1, 1]} : vector<103x208xf32> to vector<103x207xf32>
    %12 = arith.maximumf %10, %11 : vector<103x207xf32>
    %13 = arith.truncf %12 : vector<103x207xf32> to vector<103x207xbf16>
    %c0_5 = arith.constant 0 : index
    %c0_6 = arith.constant 0 : index
    %c0_7 = arith.constant 0 : index
    %14 = vector.load %arg4[%c0_5, %c0_6, %c0_7] : memref<4x40x103xbf16, #tpu.memory_space<vmem>>, vector<1x40x103xbf16>
    %15 = vector.shape_cast %14 : vector<1x40x103xbf16> to vector<40x103xbf16>
    %cst_8 = arith.constant dense<0.000000e+00> : vector<40x207xf32>
    %16 = tpu.matmul %15, %13, %cst_8 {dimension_numbers = #tpu.dot_dimension_numbers<[1], [0], [0], [1], [0, 0, 1, 1], [], []>} : vector<40x103xbf16>, vector<103x207xbf16>, vector<40x207xf32> -> vector<40x207xf32>
    %17 = arith.truncf %16 : vector<40x207xf32> to vector<40x207xbf16>
    %c0_9 = arith.constant 0 : index
    %c0_10 = arith.constant 0 : index
    %c0_11 = arith.constant 0 : index
    %18 = vector.load %arg5[%c0_9, %c0_10, %c0_11] : memref<4x207x160xbf16, #tpu.memory_space<vmem>>, vector<1x207x160xbf16>
    %19 = vector.shape_cast %18 : vector<1x207x160xbf16> to vector<207x160xbf16>
    %cst_12 = arith.constant dense<0.000000e+00> : vector<40x160xf32>
    %20 = tpu.matmul %17, %19, %cst_12 {dimension_numbers = #tpu.dot_dimension_numbers<[1], [0], [0], [1], [0, 0, 1, 1], [], []>} : vector<40x207xbf16>, vector<207x160xbf16>, vector<40x160xf32> -> vector<40x160xf32>
    %c1 = arith.constant 1 : index
    %c0_13 = arith.constant 0 : index
    %c0_14 = arith.constant 0 : index
    %21 = vector.load %arg4[%c1, %c0_13, %c0_14] : memref<4x40x103xbf16, #tpu.memory_space<vmem>>, vector<1x40x103xbf16>
    %22 = vector.shape_cast %21 : vector<1x40x103xbf16> to vector<40x103xbf16>
    %cst_15 = arith.constant dense<0.000000e+00> : vector<40x207xf32>
    %23 = tpu.matmul %22, %13, %cst_15 {dimension_numbers = #tpu.dot_dimension_numbers<[1], [0], [0], [1], [0, 0, 1, 1], [], []>} : vector<40x103xbf16>, vector<103x207xbf16>, vector<40x207xf32> -> vector<40x207xf32>
    %24 = arith.truncf %23 : vector<40x207xf32> to vector<40x207xbf16>
    %c1_16 = arith.constant 1 : index
    %c0_17 = arith.constant 0 : index
    %c0_18 = arith.constant 0 : index
    %25 = vector.load %arg5[%c1_16, %c0_17, %c0_18] : memref<4x207x160xbf16, #tpu.memory_space<vmem>>, vector<1x207x160xbf16>
    %26 = vector.shape_cast %25 : vector<1x207x160xbf16> to vector<207x160xbf16>
    %cst_19 = arith.constant dense<0.000000e+00> : vector<40x160xf32>
    %27 = tpu.matmul %24, %26, %cst_19 {dimension_numbers = #tpu.dot_dimension_numbers<[1], [0], [0], [1], [0, 0, 1, 1], [], []>} : vector<40x207xbf16>, vector<207x160xbf16>, vector<40x160xf32> -> vector<40x160xf32>
    %28 = arith.addf %20, %27 : vector<40x160xf32>
    %c2 = arith.constant 2 : index
    %c0_20 = arith.constant 0 : index
    %c0_21 = arith.constant 0 : index
    %29 = vector.load %arg4[%c2, %c0_20, %c0_21] : memref<4x40x103xbf16, #tpu.memory_space<vmem>>, vector<1x40x103xbf16>
    %30 = vector.shape_cast %29 : vector<1x40x103xbf16> to vector<40x103xbf16>
    %cst_22 = arith.constant dense<0.000000e+00> : vector<40x207xf32>
    %31 = tpu.matmul %30, %13, %cst_22 {dimension_numbers = #tpu.dot_dimension_numbers<[1], [0], [0], [1], [0, 0, 1, 1], [], []>} : vector<40x103xbf16>, vector<103x207xbf16>, vector<40x207xf32> -> vector<40x207xf32>
    %32 = arith.truncf %31 : vector<40x207xf32> to vector<40x207xbf16>
    %c2_23 = arith.constant 2 : index
    %c0_24 = arith.constant 0 : index
    %c0_25 = arith.constant 0 : index
    %33 = vector.load %arg5[%c2_23, %c0_24, %c0_25] : memref<4x207x160xbf16, #tpu.memory_space<vmem>>, vector<1x207x160xbf16>
    %34 = vector.shape_cast %33 : vector<1x207x160xbf16> to vector<207x160xbf16>
    %cst_26 = arith.constant dense<0.000000e+00> : vector<40x160xf32>
    %35 = tpu.matmul %32, %34, %cst_26 {dimension_numbers = #tpu.dot_dimension_numbers<[1], [0], [0], [1], [0, 0, 1, 1], [], []>} : vector<40x207xbf16>, vector<207x160xbf16>, vector<40x160xf32> -> vector<40x160xf32>
    %36 = arith.addf %28, %35 : vector<40x160xf32>
    %c3 = arith.constant 3 : index
    %c0_27 = arith.constant 0 : index
    %c0_28 = arith.constant 0 : index
    %37 = vector.load %arg4[%c3, %c0_27, %c0_28] : memref<4x40x103xbf16, #tpu.memory_space<vmem>>, vector<1x40x103xbf16>
    %38 = vector.shape_cast %37 : vector<1x40x103xbf16> to vector<40x103xbf16>
    %cst_29 = arith.constant dense<0.000000e+00> : vector<40x207xf32>
    %39 = tpu.matmul %38, %13, %cst_29 {dimension_numbers = #tpu.dot_dimension_numbers<[1], [0], [0], [1], [0, 0, 1, 1], [], []>} : vector<40x103xbf16>, vector<103x207xbf16>, vector<40x207xf32> -> vector<40x207xf32>
    %40 = arith.truncf %39 : vector<40x207xf32> to vector<40x207xbf16>
    %c3_30 = arith.constant 3 : index
    %c0_31 = arith.constant 0 : index
    %c0_32 = arith.constant 0 : index
    %41 = vector.load %arg5[%c3_30, %c0_31, %c0_32] : memref<4x207x160xbf16, #tpu.memory_space<vmem>>, vector<1x207x160xbf16>
    %42 = vector.shape_cast %41 : vector<1x207x160xbf16> to vector<207x160xbf16>
    %cst_33 = arith.constant dense<0.000000e+00> : vector<40x160xf32>
    %43 = tpu.matmul %40, %42, %cst_33 {dimension_numbers = #tpu.dot_dimension_numbers<[1], [0], [0], [1], [0, 0, 1, 1], [], []>} : vector<40x207xbf16>, vector<207x160xbf16>, vector<40x160xf32> -> vector<40x160xf32>
    %44 = arith.addf %36, %43 : vector<40x160xf32>
    %c0_34 = arith.constant 0 : index
    %c0_35 = arith.constant 0 : index
    %45 = vector.load %arg6[%c0_34, %c0_35] : memref<1x160xf32, #tpu.memory_space<vmem>>, vector<1x160xf32>
    %46 = vector.broadcast %45 : vector<1x160xf32> to vector<40x160xf32>
    %47 = arith.addf %44, %46 : vector<40x160xf32>
    %48 = math.tanh %47 : vector<40x160xf32>
    %49 = vector.extract_strided_slice %48 {offsets = [0, 0], sizes = [39, 160], strides = [1, 1]} : vector<40x160xf32> to vector<39x160xf32>
    %50 = vector.extract_strided_slice %48 {offsets = [1, 0], sizes = [39, 160], strides = [1, 1]} : vector<40x160xf32> to vector<39x160xf32>
    %51 = arith.maximumf %49, %50 : vector<39x160xf32>
    %52 = vector.extract_strided_slice %51 {offsets = [0, 0], sizes = [39, 159], strides = [1, 1]} : vector<39x160xf32> to vector<39x159xf32>
    %53 = vector.extract_strided_slice %51 {offsets = [0, 1], sizes = [39, 159], strides = [1, 1]} : vector<39x160xf32> to vector<39x159xf32>
    %54 = arith.maximumf %52, %53 : vector<39x159xf32>
    %55 = arith.truncf %54 : vector<39x159xf32> to vector<39x159xbf16>
    %c0_36 = arith.constant 0 : index
    %c0_37 = arith.constant 0 : index
    %c0_38 = arith.constant 0 : index
    %56 = vector.load %arg7[%c0_36, %c0_37, %c0_38] : memref<4x8x39xbf16, #tpu.memory_space<vmem>>, vector<1x8x39xbf16>
    %57 = vector.shape_cast %56 : vector<1x8x39xbf16> to vector<8x39xbf16>
    %cst_39 = arith.constant dense<0.000000e+00> : vector<8x159xf32>
    %58 = tpu.matmul %57, %55, %cst_39 {dimension_numbers = #tpu.dot_dimension_numbers<[1], [0], [0], [1], [0, 0, 1, 1], [], []>} : vector<8x39xbf16>, vector<39x159xbf16>, vector<8x159xf32> -> vector<8x159xf32>
    %59 = arith.truncf %58 : vector<8x159xf32> to vector<8x159xbf16>
    %c0_40 = arith.constant 0 : index
    %c0_41 = arith.constant 0 : index
    %c0_42 = arith.constant 0 : index
    %60 = vector.load %arg8[%c0_40, %c0_41, %c0_42] : memref<4x159x32xbf16, #tpu.memory_space<vmem>>, vector<1x159x32xbf16>
    %61 = vector.shape_cast %60 : vector<1x159x32xbf16> to vector<159x32xbf16>
    %cst_43 = arith.constant dense<0.000000e+00> : vector<8x32xf32>
    %62 = tpu.matmul %59, %61, %cst_43 {dimension_numbers = #tpu.dot_dimension_numbers<[1], [0], [0], [1], [0, 0, 1, 1], [], []>} : vector<8x159xbf16>, vector<159x32xbf16>, vector<8x32xf32> -> vector<8x32xf32>
    %c1_44 = arith.constant 1 : index
    %c0_45 = arith.constant 0 : index
    %c0_46 = arith.constant 0 : index
    %63 = vector.load %arg7[%c1_44, %c0_45, %c0_46] : memref<4x8x39xbf16, #tpu.memory_space<vmem>>, vector<1x8x39xbf16>
    %64 = vector.shape_cast %63 : vector<1x8x39xbf16> to vector<8x39xbf16>
    %cst_47 = arith.constant dense<0.000000e+00> : vector<8x159xf32>
    %65 = tpu.matmul %64, %55, %cst_47 {dimension_numbers = #tpu.dot_dimension_numbers<[1], [0], [0], [1], [0, 0, 1, 1], [], []>} : vector<8x39xbf16>, vector<39x159xbf16>, vector<8x159xf32> -> vector<8x159xf32>
    %66 = arith.truncf %65 : vector<8x159xf32> to vector<8x159xbf16>
    %c1_48 = arith.constant 1 : index
    %c0_49 = arith.constant 0 : index
    %c0_50 = arith.constant 0 : index
    %67 = vector.load %arg8[%c1_48, %c0_49, %c0_50] : memref<4x159x32xbf16, #tpu.memory_space<vmem>>, vector<1x159x32xbf16>
    %68 = vector.shape_cast %67 : vector<1x159x32xbf16> to vector<159x32xbf16>
    %cst_51 = arith.constant dense<0.000000e+00> : vector<8x32xf32>
    %69 = tpu.matmul %66, %68, %cst_51 {dimension_numbers = #tpu.dot_dimension_numbers<[1], [0], [0], [1], [0, 0, 1, 1], [], []>} : vector<8x159xbf16>, vector<159x32xbf16>, vector<8x32xf32> -> vector<8x32xf32>
    %70 = arith.addf %62, %69 : vector<8x32xf32>
    %c2_52 = arith.constant 2 : index
    %c0_53 = arith.constant 0 : index
    %c0_54 = arith.constant 0 : index
    %71 = vector.load %arg7[%c2_52, %c0_53, %c0_54] : memref<4x8x39xbf16, #tpu.memory_space<vmem>>, vector<1x8x39xbf16>
    %72 = vector.shape_cast %71 : vector<1x8x39xbf16> to vector<8x39xbf16>
    %cst_55 = arith.constant dense<0.000000e+00> : vector<8x159xf32>
    %73 = tpu.matmul %72, %55, %cst_55 {dimension_numbers = #tpu.dot_dimension_numbers<[1], [0], [0], [1], [0, 0, 1, 1], [], []>} : vector<8x39xbf16>, vector<39x159xbf16>, vector<8x159xf32> -> vector<8x159xf32>
    %74 = arith.truncf %73 : vector<8x159xf32> to vector<8x159xbf16>
    %c2_56 = arith.constant 2 : index
    %c0_57 = arith.constant 0 : index
    %c0_58 = arith.constant 0 : index
    %75 = vector.load %arg8[%c2_56, %c0_57, %c0_58] : memref<4x159x32xbf16, #tpu.memory_space<vmem>>, vector<1x159x32xbf16>
    %76 = vector.shape_cast %75 : vector<1x159x32xbf16> to vector<159x32xbf16>
    %cst_59 = arith.constant dense<0.000000e+00> : vector<8x32xf32>
    %77 = tpu.matmul %74, %76, %cst_59 {dimension_numbers = #tpu.dot_dimension_numbers<[1], [0], [0], [1], [0, 0, 1, 1], [], []>} : vector<8x159xbf16>, vector<159x32xbf16>, vector<8x32xf32> -> vector<8x32xf32>
    %78 = arith.addf %70, %77 : vector<8x32xf32>
    %c3_60 = arith.constant 3 : index
    %c0_61 = arith.constant 0 : index
    %c0_62 = arith.constant 0 : index
    %79 = vector.load %arg7[%c3_60, %c0_61, %c0_62] : memref<4x8x39xbf16, #tpu.memory_space<vmem>>, vector<1x8x39xbf16>
    %80 = vector.shape_cast %79 : vector<1x8x39xbf16> to vector<8x39xbf16>
    %cst_63 = arith.constant dense<0.000000e+00> : vector<8x159xf32>
    %81 = tpu.matmul %80, %55, %cst_63 {dimension_numbers = #tpu.dot_dimension_numbers<[1], [0], [0], [1], [0, 0, 1, 1], [], []>} : vector<8x39xbf16>, vector<39x159xbf16>, vector<8x159xf32> -> vector<8x159xf32>
    %82 = arith.truncf %81 : vector<8x159xf32> to vector<8x159xbf16>
    %c3_64 = arith.constant 3 : index
    %c0_65 = arith.constant 0 : index
    %c0_66 = arith.constant 0 : index
    %83 = vector.load %arg8[%c3_64, %c0_65, %c0_66] : memref<4x159x32xbf16, #tpu.memory_space<vmem>>, vector<1x159x32xbf16>
    %84 = vector.shape_cast %83 : vector<1x159x32xbf16> to vector<159x32xbf16>
    %cst_67 = arith.constant dense<0.000000e+00> : vector<8x32xf32>
    %85 = tpu.matmul %82, %84, %cst_67 {dimension_numbers = #tpu.dot_dimension_numbers<[1], [0], [0], [1], [0, 0, 1, 1], [], []>} : vector<8x159xbf16>, vector<159x32xbf16>, vector<8x32xf32> -> vector<8x32xf32>
    %86 = arith.addf %78, %85 : vector<8x32xf32>
    %c0_68 = arith.constant 0 : index
    %c0_69 = arith.constant 0 : index
    %87 = vector.load %arg9[%c0_68, %c0_69] : memref<1x32xf32, #tpu.memory_space<vmem>>, vector<1x32xf32>
    %88 = vector.broadcast %87 : vector<1x32xf32> to vector<8x32xf32>
    %89 = arith.addf %86, %88 : vector<8x32xf32>
    %90 = math.tanh %89 : vector<8x32xf32>
    %91 = arith.truncf %90 : vector<8x32xf32> to vector<8x32xbf16>
    %c0_70 = arith.constant 0 : index
    %c0_71 = arith.constant 0 : index
    %92 = vector.load %arg10[%c0_70, %c0_71] : memref<32x10xbf16, #tpu.memory_space<vmem>>, vector<32x10xbf16>
    %cst_72 = arith.constant dense<0.000000e+00> : vector<8x10xf32>
    %93 = tpu.matmul %91, %92, %cst_72 {dimension_numbers = #tpu.dot_dimension_numbers<[1], [0], [0], [1], [0, 0, 1, 1], [], []>} : vector<8x32xbf16>, vector<32x10xbf16>, vector<8x10xf32> -> vector<8x10xf32>
    %c0_73 = arith.constant 0 : index
    %c0_74 = arith.constant 0 : index
    %94 = vector.load %arg11[%c0_73, %c0_74] : memref<1x10xf32, #tpu.memory_space<vmem>>, vector<1x10xf32>
    %95 = vector.broadcast %94 : vector<1x10xf32> to vector<8x10xf32>
    %96 = arith.addf %93, %95 : vector<8x10xf32>
    %c0_75 = arith.constant 0 : index
    %c0_76 = arith.constant 0 : index
    %97 = vector.load %arg12[%c0_75, %c0_76] : memref<8x10xf32, #tpu.memory_space<vmem>>, vector<8x10xf32>
    tpu.vector_store %arg12[%c0_75, %c0_76], %96 {strides = array<i32>} : memref<8x10xf32, #tpu.memory_space<vmem>>, vector<8x10xf32>,
    return
  }
  func.func @transform_0(%arg0: i32) -> (i32, i32) {
    %c0_i32 = arith.constant 0 : i32
    %c0_i32_0 = arith.constant 0 : i32
    return %arg0, %c0_i32 : i32, i32
  }
  func.func @transform_1(%arg0: i32) -> (i32, i32) {
    %c0_i32 = arith.constant 0 : i32
    %c0_i32_0 = arith.constant 0 : i32
    %c0_i32_1 = arith.constant 0 : i32
    return %c0_i32, %c0_i32_0 : i32, i32
  }
  func.func @transform_2(%arg0: i32) -> (i32, i32) {
    %c0_i32 = arith.constant 0 : i32
    %c0_i32_0 = arith.constant 0 : i32
    %c0_i32_1 = arith.constant 0 : i32
    return %c0_i32, %c0_i32_0 : i32, i32
  }
  func.func @transform_3(%arg0: i32) -> (i32, i32, i32) {
    %c0_i32 = arith.constant 0 : i32
    %c0_i32_0 = arith.constant 0 : i32
    %c0_i32_1 = arith.constant 0 : i32
    %c0_i32_2 = arith.constant 0 : i32
    return %c0_i32, %c0_i32_0, %c0_i32_1 : i32, i32, i32
  }
  func.func @transform_4(%arg0: i32) -> (i32, i32, i32) {
    %c0_i32 = arith.constant 0 : i32
    %c0_i32_0 = arith.constant 0 : i32
    %c0_i32_1 = arith.constant 0 : i32
    %c0_i32_2 = arith.constant 0 : i32
    return %c0_i32, %c0_i32_0, %c0_i32_1 : i32, i32, i32
  }
  func.func @transform_5(%arg0: i32) -> (i32, i32) {
    %c0_i32 = arith.constant 0 : i32
    %c0_i32_0 = arith.constant 0 : i32
    %c0_i32_1 = arith.constant 0 : i32
    return %c0_i32, %c0_i32_0 : i32, i32
  }
  func.func @transform_6(%arg0: i32) -> (i32, i32, i32) {
    %c0_i32 = arith.constant 0 : i32
    %c0_i32_0 = arith.constant 0 : i32
    %c0_i32_1 = arith.constant 0 : i32
    %c0_i32_2 = arith.constant 0 : i32
    return %c0_i32, %c0_i32_0, %c0_i32_1 : i32, i32, i32
  }
  func.func @transform_7(%arg0: i32) -> (i32, i32, i32) {
    %c0_i32 = arith.constant 0 : i32
    %c0_i32_0 = arith.constant 0 : i32
    %c0_i32_1 = arith.constant 0 : i32
    %c0_i32_2 = arith.constant 0 : i32
    return %c0_i32, %c0_i32_0, %c0_i32_1 : i32, i32, i32
  }
  func.func @transform_8(%arg0: i32) -> (i32, i32) {
    %c0_i32 = arith.constant 0 : i32
    %c0_i32_0 = arith.constant 0 : i32
    %c0_i32_1 = arith.constant 0 : i32
    return %c0_i32, %c0_i32_0 : i32, i32
  }
  func.func @transform_9(%arg0: i32) -> (i32, i32) {
    %c0_i32 = arith.constant 0 : i32
    %c0_i32_0 = arith.constant 0 : i32
    %c0_i32_1 = arith.constant 0 : i32
    return %c0_i32, %c0_i32_0 : i32, i32
  }
  func.func @transform_10(%arg0: i32) -> (i32, i32) {
    %c0_i32 = arith.constant 0 : i32
    %c0_i32_0 = arith.constant 0 : i32
    %c0_i32_1 = arith.constant 0 : i32
    return %c0_i32, %c0_i32_0 : i32, i32
  }
  func.func @transform_11(%arg0: i32) -> (i32, i32) {
    %c0_i32 = arith.constant 0 : i32
    %c0_i32_0 = arith.constant 0 : i32
    return %arg0, %c0_i32 : i32, i32
  }
}

</mosaic_0001>

<bundles_post_ra>
// kernel: mnist_cnn_forward.1
= control target key start
LH: loop header
LB: loop body
LE: loop exit
PB: predicated region body
PF: predicated region fallthrough
CT: control target
= control target key end

     0   :  { %16 = vsyncpa [#allocation3], 0  ;;  %s5725_s0 = inlined_call_operand.vmem [shape: bf16[208,224], index: 0, kind: input, shape index: {}]   ;;  %s5726_s1 = inlined_call_operand.vmem [shape: bf16[224,208], index: 1, kind: input, shape index: {}]   ;;  %s5727_s2 = inlined_call_operand.vmem [shape: f32[1,208], index: 2, kind: input, shape index: {}]   ;;  %s5728_s3 = inlined_call_operand.vmem [shape: bf16[4,40,103], index: 3, kind: input, shape index: {}]   ;;  %s5729_s4 = inlined_call_operand.vmem [shape: bf16[4,207,160], index: 4, kind: input, shape index: {}]   ;;  %s5730_s5 = inlined_call_operand.vmem [shape: f32[1,160], index: 5, kind: input, shape index: {}]   ;;  %s5731_s6 = inlined_call_operand.vmem [shape: bf16[4,8,39], index: 6, kind: input, shape index: {}]   ;;  %s5732_s7 = inlined_call_operand.vmem [shape: bf16[4,159,32], index: 7, kind: input, shape index: {}]   ;;  %s5733_s8 = inlined_call_operand.vmem [shape: f32[1,32], index: 8, kind: input, shape index: {}]   ;;  %s5734_s9 = inlined_call_operand.vmem [shape: bf16[32,10], index: 9, kind: input, shape index: {}]   ;;  %s5735_s10 = inlined_call_operand.vmem [shape: f32[1,10], index: 10, kind: input, shape index: {}]   ;;  %s5736_s11 = inlined_call_operand.hbm [shape: f32[16,10], index: 11, kind: output, shape index: {}]  }
   0x1   :  { %18 = vsyncpa [#allocation3 + $0x1], 0  ;;  %s4469_s17 = smov 0   ;;  %s4471_s18 = smov 0  }
   0x2   :  { %s4473_s19 = smov 0   ;;  %s4475_s20 = smov 0  }
   0x3 LB: > { %5738 = sst [smem:[#allocation5_spill]] %s4397_s19  ;;  %s4490_s21 = sadd.s32 4294967295, %s4401_s20   ;;  %s4401_s20 = sphi %s4475_s20, %s5747_s20   ;;  %s4397_s19 = sphi %s4473_s19, %s5746_s19   ;;  %s4393_s18 = sphi %s4471_s18, %s5745_s18   ;;  %s4389_s17 = sphi %s4469_s17, %s5744_s17  }
   0x4   : > { %s3414_s22 = sadd.s32 4294967294, %s4401_s20   ;;  %s4494_s23 = sadd.s32 1, %s4401_s20  }
   0x5   : > { %s267_s24 = sadd.s32 1, %s4397_s19  ;;  %s264_s25 = ssub.s32 %s4401_s20, %s4494_s23 }
   0x6   : > { %p277_p0 = scmp.ne.s32.totalorder %s4397_s19, %s4393_s18  ;;  %p265_p1 = scmp.eq.s32.totalorder %s264_s25, 0 }
   0x7   : > { %p278_p2 = scmp.eq.s32.totalorder %s4490_s21, 1  ;;  %p283_p3 = scmp.ne.s32.totalorder %s4393_s18, %s4389_s17 }
   0x8   : > { %p284_p4 = scmp.eq.s32.totalorder %s3414_s22, 1  ;;  %p3417_p7 = scmp.ge.s32.totalorder %s4401_s20, 1 }
   0x9   : > { %s4505_s26 = scalar_select %p265_p1, %s4397_s19, %s267_s24  }
   0xa   : > { %p4507_p5 = por %p278_p2, %p277_p0  ;;  %p4511_p6 = por %p284_p4, %p283_p3 }
   0xb   : > { %5739 = sst [smem:[#allocation6_spill]] %s4505_s26  ;;  %p342_p8 = scmp.lt.s32.totalorder %s4401_s20, 3 }
   0xd   : > { %p343_p9 = pnand %p3417_p7, %p342_p8 }
   0xe   : > { %v3993_v0 = vld [vmem:[%s5726_s1 + $0x4] ss:$8 sps:$4 sm:$0xff] (!%p343_p9)   ;;  %v3995_v1 = vld [vmem:[%s5726_s1] ss:$8 sps:$4 sm:$0xff] (!%p343_p9)   ;;  %s383_s14 = smul.u32 (!%p343_p9), 13, %s4490_s21  ;;  %vm644_vm0 = vcmask (!%p343_p9), 785408   ;;  %v434_v43 = vlaneseq (!%p343_p9) }
   0xf   : > { %346 = sbr.rel (%p343_p9) target bundleno = 2228 (0x8b4), region = 64  ;;  %666 = vmatprep.subr.bf16.mxu0 (!%p343_p9), %v3993_v0  ;;  %v3996_v2 = vld [vmem:[%s5726_s1 + $0x14] ss:$8 sps:$4 sm:$0xff] (!%p343_p9)   ;;  %v3998_v3 = vld [vmem:[%s5726_s1 + $0x10] ss:$8 sps:$4 sm:$0xff] (!%p343_p9)   ;;  %vm819_vm1 = vcmask (!%p343_p9), 1046528  }
  0x10   : > { %667 = vmatpush1.bf16.msra.mxu0 (!%p343_p9), %v3995_v1  ;;  %v3999_v4 = vld [vmem:[%s5726_s1 + $0x24] ss:$8 sps:$4 sm:$0xff] (!%p343_p9)   ;;  %p384_p10 = scmp.lt.s32.totalorder (!%p343_p9), %s383_s14, 25  ;;  %v4001_v5 = vld [vmem:[%s5726_s1 + $0x20] ss:$8 sps:$4 sm:$0xff] (!%p343_p9)   ;;  %v4627_v44 = vshrl.u32 (!%p343_p9), %v434_v43, 7 }
  0x11   : > { %668 = vmatprep.subr.bf16.mxu0 (!%p343_p9), %v3996_v2  ;;  %v4002_v6 = vld [vmem:[%s5726_s1 + $0x34] ss:$8 sps:$4 sm:$0xff] (!%p343_p9)   ;;  %v4004_v7 = vld [vmem:[%s5726_s1 + $0x30] ss:$8 sps:$4 sm:$0xff] (!%p343_p9)   ;;  %v4005_v8 = vld [vmem:[%s5726_s1 + $0x44] ss:$8 sps:$4 sm:$0xff] (!%p343_p9)  }
  0x12   : > { %v4007_v9 = vld [vmem:[%s5726_s1 + $0x40] ss:$8 sps:$4 sm:$0xff] (!%p343_p9)   ;;  %v4008_v10 = vld [vmem:[%s5726_s1 + $0x54] ss:$8 sps:$4 sm:$0xff] (!%p343_p9)   ;;  %v4010_v11 = vld [vmem:[%s5726_s1 + $0x50] ss:$8 sps:$4 sm:$0xff] (!%p343_p9)  }
  0x13   : > { %v4011_v13 = vld [vmem:[%s5726_s1 + $0x64] ss:$8 sps:$4 sm:$0xff] (!%p343_p9)   ;;  %v4013_v14 = vld [vmem:[%s5726_s1 + $0x60] ss:$8 sps:$4 sm:$0xff] (!%p343_p9)   ;;  %v4014_v15 = vld [vmem:[%s5726_s1 + $0x74] ss:$8 sps:$4 sm:$0xff] (!%p343_p9)  }
  0x14   : > { %669 = vmatpush1.bf16.msra.mxu0 (!%p343_p9), %v3998_v3  ;;  %v4016_v16 = vld [vmem:[%s5726_s1 + $0x70] ss:$8 sps:$4 sm:$0xff] (!%p343_p9)   ;;  %v4017_v17 = vld [vmem:[%s5726_s1 + $0x84] ss:$8 sps:$4 sm:$0xff] (!%p343_p9)   ;;  %v4019_v18 = vld [vmem:[%s5726_s1 + $0x80] ss:$8 sps:$4 sm:$0xff] (!%p343_p9)  }
  0x15   : > { %670 = vmatprep.subr.bf16.mxu0 (!%p343_p9), %v3999_v4  ;;  %v4020_v19 = vld [vmem:[%s5726_s1 + $0x94] ss:$8 sps:$4 sm:$0xff] (!%p343_p9)   ;;  %v4022_v20 = vld [vmem:[%s5726_s1 + $0x90] ss:$8 sps:$4 sm:$0xff] (!%p343_p9)   ;;  %v4023_v21 = vld [vmem:[%s5726_s1 + $0xa4] ss:$8 sps:$4 sm:$0xff] (!%p343_p9)  }
  0x16   : > { %s5749_s14 = smov (!%p384_p10, %s383_s14), 25  ;;  %v4025_v22 = vld [vmem:[%s5726_s1 + $0xa0] ss:$8 sps:$4 sm:$0xff]   ;;  %v4026_v23 = vld [vmem:[%s5726_s1 + $0xb4] ss:$8 sps:$4 sm:$0xff]   ;;  %v436_v45 = vsub.s32 0, %v4627_v44 }
  0x17   : > { %s3823_s29 = sshll.u32 %s5749_s14, 3  ;;  %v4028_v24 = vld [vmem:[%s5726_s1 + $0xb0] ss:$8 sps:$4 sm:$0xff]   ;;  %v4029_v25 = vld [vmem:[%s5726_s1 + $0xc4] ss:$8 sps:$4 sm:$0xff]   ;;  %v440_v47 = vsub.s32 1, %v4627_v44 }
  0x18   : > { %671 = vmatpush1.bf16.msra.mxu0 %v4001_v5  ;;  %s4554_s16 = scalar_lea.vmem %s5725_s0, %s3823_s29  ;;  %v4031_v26 = vld [vmem:[%s5726_s1 + $0xc0] ss:$8 sps:$4 sm:$0xff]   ;;  %v4032_v27 = vld [vmem:[%s5726_s1 + $0xd4] ss:$8 sps:$4 sm:$0xff]   ;;  %v4034_v28 = vld [vmem:[%s5726_s1 + $0xd0] ss:$8 sps:$4 sm:$0xff]  }
  0x19   : > { %672 = vmatprep.subr.bf16.mxu0 %v4002_v6  ;;  %v4037_v12 = vld [vmem:[%s4554_s16 + $0x4] ss:$8 sps:$4 sm:$0xff]   ;;  %v4035_v29 = vld [vmem:[%s4554_s16] ss:$8 sps:$4 sm:$0xff]   ;;  %v4038_v30 = vld [vmem:[%s4554_s16 + $0x14] ss:$8 sps:$4 sm:$0xff]  }
  0x1a   : > { %3463 = vmatprep.mubr.msk.bf16.mxu0 %vm644_vm0, %v4037_v12  ;;  %v4040_v31 = vld [vmem:[%s4554_s16 + $0x10] ss:$8 sps:$4 sm:$0xff]   ;;  %v4041_v32 = vld [vmem:[%s4554_s16 + $0x24] ss:$8 sps:$4 sm:$0xff]   ;;  %v4043_v33 = vld [vmem:[%s4554_s16 + $0x20] ss:$8 sps:$4 sm:$0xff]  }
  0x1b   : > { %v4044_v34 = vld [vmem:[%s4554_s16 + $0x34] ss:$8 sps:$4 sm:$0xff]   ;;  %v4046_v35 = vld [vmem:[%s4554_s16 + $0x30] ss:$8 sps:$4 sm:$0xff]   ;;  %v4047_v36 = vld [vmem:[%s4554_s16 + $0x44] ss:$8 sps:$4 sm:$0xff]  }
  0x1c   : > { %673 = vmatpush1.bf16.msra.mxu0 %v4004_v7  ;;  %v4049_v37 = vld [vmem:[%s4554_s16 + $0x40] ss:$8 sps:$4 sm:$0xff]   ;;  %v4050_v38 = vld [vmem:[%s4554_s16 + $0x54] ss:$8 sps:$4 sm:$0xff]   ;;  %v4052_v40 = vld [vmem:[%s4554_s16 + $0x50] ss:$8 sps:$4 sm:$0xff]  }
  0x1d   : > { %674 = vmatprep.subr.bf16.mxu0 %v4005_v8  ;;  %v403_v39 = vld [vmem:[%s4554_s16 + $0x60] sm:$0xff]  ;;  %s4403_s16 = smov 127   ;;  %vm1000_vm2 = vcmask 1039360   ;;  %vm1108_vm3 = vcmask 1042432   ;;  %vm1109_vm4 = vcmask 1043456   ;;  %vm1098_vm5 = vcmask 842752  }
  0x1e   : > { %v3434_v41 = vcombine.high %v403_v39, %v403_v39  ;;  %v3433_v42 = vcombine.low %v403_v39, %v403_v39  ;;  %v432_v46 = vld [vmem:[%s5727_s2] sm:$0x3]  ;;  %vm1471_vm6 = vcmask 1047552   ;;  %vm1461_vm7 = vcmask 646144   ;;  %s380_s30 = sand.u32 1, %s4393_s18   ;;  %s3820_s29 = sshll.u32 %s4490_s21, 7 }
  0x1f   : > { %v4636_v48 = vrot.slane %v432_v46, %v436_v45  ;;  %v4640_v49 = vrot.slane %v432_v46, %v440_v47  ;;  %vm2559_vm8 = vcmask 318464   ;;  %vm2760_vm9 = vcmask 252928   ;;  %s3418_s19 = sshll.u32 %s380_s30, 3  ;;  %s5683_s14 = scalar_lea.hbm %s5736_s11, %s3820_s29 }
  0x20   : > { %675 = vmatpush1.bf16.msra.mxu0 %v4007_v9  ;;  %vm4407_vm10 = vmmov 0   ;;  %vm3295_vm11 = vcmask 261120   ;;  %s382_s12 = scalar_lea.vmem [#allocation2], %s3418_s19  ;;  %vm3339_vm12 = vcmask 80896   ;;  %s3342_s21 = scalar_lea.sflag [#allocation3], %s380_s30 }
  0x21   : > { %676 = vmatprep.subr.bf16.mxu0 %v4008_v10  ;;  %s3355_s13 = sshll.u32 %s382_s12, 4  ;;  %s4408_s25 = smov [#allocation2]   ;;  %s5685_s13 = int_to_ptr.vmem [resolvable:$true] %s3355_s13 }
  0x22   : > { %s4339_s24 = scalar_lea.vmem %s5685_s13, 128  ;;  %s4343_s19 = sshll.u32 %s4408_s25, 4  ;;  %s4344_s19 = int_to_ptr.vmem [resolvable:$false] %s4343_s19 }
  0x23   : > { %p4340_p11 = scmp.ne.s32.totalorder %s5685_s13, %s4339_s24  ;;  %p4346_p0 = scmp.lt.s32.totalorder %s5685_s13, %s4344_s19 }
  0x24   : > { %677 = vmatpush1.bf16.msra.mxu0 %v4010_v11 }
  0x25   : > { %678 = vmatprep.subr.bf16.mxu0 %v4011_v13  ;;  %p4341_p12 = pnand %p4340_p11, %p4507_p5 }
  0x27   : > { %p4342_p13 = pneg %p4341_p12 }
  0x28   : > { %679 = vmatpush1.bf16.msra.mxu0 %v4013_v14 }
  0x29   : > { %680 = vmatprep.subr.bf16.mxu0 %v4014_v15 }
  0x2c   : > { %681 = vmatpush1.bf16.msra.mxu0 %v4016_v16 }
  0x2d   : > { %682 = vmatprep.subr.bf16.mxu0 %v4017_v17 }
  0x30   : > { %683 = vmatpush1.bf16.msra.mxu0 %v4019_v18 }
  0x31   : > { %684 = vmatprep.subr.bf16.mxu0 %v4020_v19 }
  0x34   : > { %685 = vmatpush1.bf16.msra.mxu0 %v4022_v20 }
  0x35   : > { %686 = vmatprep.subr.bf16.mxu0 %v4023_v21 }
  0x38   : > { %687 = vmatpush1.bf16.msra.mxu0 %v4025_v22 }
  0x39   : > { %688 = vmatprep.subr.bf16.mxu0 %v4026_v23 }
  0x3c   : > { %689 = vmatpush1.bf16.msra.mxu0 %v4028_v24 }
  0x3d   : > { %690 = vmatprep.subr.bf16.mxu0 %v4029_v25 }
  0x40   : > { %691 = vmatpush1.bf16.msra.mxu0 %v4031_v26 }
  0x41   : > { %692 = vmatprep.subr.bf16.mxu0 %v4032_v27 }
  0x44   : > { %693 = vmatpush1.bf16.msra.mxu0 %v4034_v28 }
  0x47   : > { %699 = vmatmul.mubr.bf16.vlgmr.msra.gmra.mrb[0].mxu0 %v4035_v29 }
  0x48   : > { %3464 = vmatprep.mubr.msk.bf16.mxu0 %vm644_vm0, %v4038_v30 }
  0x4f   : > { %709 = vmatmul.mubr.bf16.gmra.mrb[4].mxu0 %v4040_v31 }
  0x50   : > { %3465 = vmatprep.mubr.msk.bf16.mxu0 %vm644_vm0, %v4041_v32 }
  0x57   : > { %719 = vmatmul.mubr.bf16.gmra.mrb[8].mxu0 %v4043_v33 }
  0x58   : > { %3466 = vmatprep.mubr.msk.bf16.mxu0 %vm644_vm0, %v4044_v34 }
  0x5f   : > { %729 = vmatmul.mubr.bf16.gmra.mrb[12].mxu0 %v4046_v35 }
  0x60   : > { %3467 = vmatprep.mubr.msk.bf16.mxu0 %vm644_vm0, %v4047_v36 }
  0x67   : > { %739 = vmatmul.mubr.bf16.gmra.mrb[16].mxu0 %v4049_v37 }
  0x68   : > { %3468 = vmatprep.mubr.msk.bf16.mxu0 %vm644_vm0, %v4050_v38 }
  0x6f   : > { %749 = vmatmul.mubr.bf16.gmra.mrb[20].mxu0 %v4052_v40 }
  0x70   : > { %3469 = vmatprep.mubr.msk.bf16.mxu0 %vm644_vm0, %v3434_v41 }
  0x77   : > { %759 = vmatmul.mubr.bf16.gmra.mrb[24].mxu0 %v3433_v42 }
 0x11a   : > { %v700_v50 = vpop.f32.mrb[0].mxu0 }
 0x11b   : > { %v701_v51 = vadd.f32 %v700_v50, %v4636_v48  ;;  %v702_v52 = vpop.f32.mrb[1].mxu0 }
 0x11c   : > { %v703_v53 = vadd.f32 %v702_v52, %v4640_v49  ;;  %v704_v54 = vpop.f32.mrb[2].mxu0 }
 0x11d   : > { %4265 = vtanh.f32 %v701_v51  ;;  %v705_v55 = vadd.f32 %v704_v54, %v4636_v48  ;;  %v706_v56 = vpop.f32.mrb[3].mxu0 }
 0x11e   : > { %4267 = vtanh.f32 %v703_v53  ;;  %v707_v57 = vadd.f32 %v706_v56, %v4640_v49 }
 0x11f   : > { %4269 = vtanh.f32 %v705_v55 }
 0x120   : > { %4271 = vtanh.f32 %v707_v57 }
 0x122   : > { %v710_v58 = vpop.f32.mrb[4].mxu0 }
 0x123   : > { %v711_v59 = vadd.f32 %v710_v58, %v4636_v48  ;;  %v712_v60 = vpop.f32.mrb[5].mxu0 }
 0x124   : > { %v713_v61 = vadd.f32 %v712_v60, %v4640_v49  ;;  %v714_v62 = vpop.f32.mrb[6].mxu0 }
 0x125   : > { %4273 = vtanh.f32 %v711_v59  ;;  %v715_v63 = vadd.f32 %v714_v62, %v4636_v48  ;;  %v716_v0 = vpop.f32.mrb[7].mxu0 }
 0x126   : > { %4275 = vtanh.f32 %v713_v61  ;;  %v717_v1 = vadd.f32 %v716_v0, %v4640_v49 }
 0x127   : > { %v4266_v2 = vpop.eup %4265  ;;  %4277 = vtanh.f32 %v715_v63 }
 0x128   : > { %v4268_v3 = vpop.eup %4267  ;;  %4279 = vtanh.f32 %v717_v1  ;;  %v820_v7 = vrot.slane %v4266_v2, 1 }
 0x129   : > { %v4270_v4 = vpop.eup %4269  ;;  %v823_v11 = vrot.slane %v4268_v3, 1 }
 0x12a   : > { %v4272_v5 = vpop.eup %4271  ;;  %v720_v6 = vpop.f32.mrb[8].mxu0  ;;  %v821_v8 = vrot.slane %v4270_v4, 1 }
 0x12b   : > { %v721_v9 = vadd.f32 %v720_v6, %v4636_v48  ;;  %v722_v10 = vpop.f32.mrb[9].mxu0  ;;  %v824_v12 = vrot.slane %v4272_v5, 1 }
 0x12c   : > { %v723_v13 = vadd.f32 %v722_v10, %v4640_v49  ;;  %v724_v14 = vpop.f32.mrb[10].mxu0  ;;  %v822_v15 = vsel %vm819_vm1, %v820_v7, %v821_v8 }
 0x12d   : > { %4281 = vtanh.f32 %v721_v9  ;;  %v725_v16 = vadd.f32 %v724_v14, %v4636_v48  ;;  %v726_v17 = vpop.f32.mrb[11].mxu0  ;;  %v825_v18 = vsel %vm819_vm1, %v823_v11, %v824_v12  ;;  %v4655_v19 = vmax.f32 %v4266_v2, %v822_v15 }
 0x12e   : > { %4283 = vtanh.f32 %v723_v13  ;;  %v727_v20 = vadd.f32 %v726_v17, %v4640_v49  ;;  %v4658_v21 = vmax.f32 %v4268_v3, %v825_v18 }
 0x12f   : > { %v4274_v22 = vpop.eup %4273  ;;  %4285 = vtanh.f32 %v725_v16 }
 0x130   : > { %v4276_v23 = vpop.eup %4275  ;;  %4287 = vtanh.f32 %v727_v20  ;;  %v3903_v24 = vpack.i.bf16 %v4658_v21, %v4655_v19  ;;  %v826_v25 = vrot.slane %v4274_v22, 1 }
 0x131   : > { %v4278_v26 = vpop.eup %4277  ;;  %v828_v27 = vrot.slane %v4276_v23, 1 }
 0x132   : > { %v4280_v28 = vpop.eup %4279  ;;  %v730_v29 = vpop.f32.mrb[12].mxu0  ;;  %3904 = vrot.lane.b32.xlu0 %v3903_v24, %s4403_s16  ;;  %v827_v30 = vsel %vm819_vm1, %v821_v8, %v826_v25  ;;  %v830_v31 = vrot.slane %v4278_v26, 1 }
 0x133   : > { %v731_v32 = vadd.f32 %v730_v29, %v4636_v48  ;;  %v732_v33 = vpop.f32.mrb[13].mxu0  ;;  %v829_v34 = vsel %vm819_vm1, %v824_v12, %v828_v27  ;;  %v4666_v35 = vmax.f32 %v4270_v4, %v827_v30  ;;  %v832_v36 = vrot.slane %v4280_v28, 1 }
 0x134   : > { %v733_v37 = vadd.f32 %v732_v33, %v4640_v49  ;;  %v734_v38 = vpop.f32.mrb[14].mxu0  ;;  %v4669_v39 = vmax.f32 %v4272_v5, %v829_v34  ;;  %v831_v40 = vsel %vm819_vm1, %v826_v25, %v830_v31 }
 0x135   : > { %4289 = vtanh.f32 %v731_v32  ;;  %v735_v41 = vadd.f32 %v734_v38, %v4636_v48  ;;  %v736_v42 = vpop.f32.mrb[15].mxu0  ;;  %v833_v43 = vsel %vm819_vm1, %v828_v27, %v832_v36  ;;  %v4674_v46 = vmax.f32 %v4274_v22, %v831_v40 }
 0x136   : > { %4291 = vtanh.f32 %v733_v37  ;;  %v737_v50 = vadd.f32 %v736_v42, %v4640_v49  ;;  %v3908_v51 = vpack.i.bf16 %v4669_v39, %v4666_v35  ;;  %v4679_v52 = vmax.f32 %v4276_v23, %v833_v43 }
 0x137   : > { %v4282_v53 = vpop.eup %4281  ;;  %4293 = vtanh.f32 %v735_v41 }
 0x138   : > { %v4284_v54 = vpop.eup %4283  ;;  %4295 = vtanh.f32 %v737_v50  ;;  %3909 = vrot.lane.b32.xlu0 %v3908_v51, %s4403_s16  ;;  %v3913_v55 = vpack.i.bf16 %v4679_v52, %v4674_v46  ;;  %v834_v56 = vrot.slane %v4282_v53, 1 }
 0x139   : > { %v4286_v57 = vpop.eup %4285  ;;  %v836_v58 = vrot.slane %v4284_v54, 1 }
 0x13a   : > { %v4288_v59 = vpop.eup %4287  ;;  %v740_v60 = vpop.f32.mrb[16].mxu0  ;;  %3914 = vrot.lane.b32.xlu1 %v3913_v55, %s4403_s16  ;;  %v835_v61 = vsel %vm819_vm1, %v830_v31, %v834_v56  ;;  %v838_v62 = vrot.slane %v4286_v57, 1 }
 0x13b   : > { %v741_v63 = vadd.f32 %v740_v60, %v4636_v48  ;;  %v742_v0 = vpop.f32.mrb[17].mxu0  ;;  %v837_v1 = vsel %vm819_vm1, %v832_v36, %v836_v58  ;;  %v4688_v2 = vmax.f32 %v4278_v26, %v835_v61  ;;  %v840_v3 = vrot.slane %v4288_v59, 1 }
 0x13c   : > { %v743_v4 = vadd.f32 %v742_v0, %v4640_v49  ;;  %v744_v5 = vpop.f32.mrb[18].mxu0  ;;  %v4691_v6 = vmax.f32 %v4280_v28, %v837_v1  ;;  %v839_v7 = vsel %vm819_vm1, %v834_v56, %v838_v62 }
 0x13d   : > { %4297 = vtanh.f32 %v741_v63  ;;  %v745_v8 = vadd.f32 %v744_v5, %v4636_v48  ;;  %v746_v9 = vpop.f32.mrb[19].mxu0  ;;  %v841_v10 = vsel %vm819_vm1, %v836_v58, %v840_v3  ;;  %v4696_v11 = vmax.f32 %v4282_v53, %v839_v7 }
 0x13e   : > { %4299 = vtanh.f32 %v743_v4  ;;  %v747_v12 = vadd.f32 %v746_v9, %v4640_v49  ;;  %v3918_v13 = vpack.i.bf16 %v4691_v6, %v4688_v2  ;;  %v4701_v14 = vmax.f32 %v4284_v54, %v841_v10 }
 0x13f   : > { %v4290_v15 = vpop.eup %4289  ;;  %4301 = vtanh.f32 %v745_v8 }
 0x140   : > { %v4292_v16 = vpop.eup %4291  ;;  %4303 = vtanh.f32 %v747_v12  ;;  %3919 = vrot.lane.b32.xlu1 %v3918_v13, %s4403_s16  ;;  %v3923_v17 = vpack.i.bf16 %v4701_v14, %v4696_v11  ;;  %v842_v18 = vrot.slane %v4290_v15, 1 }
 0x141   : > { %v4294_v20 = vpop.eup %4293  ;;  %v844_v22 = vrot.slane %v4292_v16, 1 }
 0x142   : > { %v4296_v23 = vpop.eup %4295  ;;  %v750_v24 = vpop.f32.mrb[20].mxu0  ;;  %3924 = vrot.lane.b32.xlu0 %v3923_v17, %s4403_s16  ;;  %v843_v25 = vsel %vm819_vm1, %v838_v62, %v842_v18  ;;  %v846_v26 = vrot.slane %v4294_v20, 1 }
 0x143   : > { %v751_v27 = vadd.f32 %v750_v24, %v4636_v48  ;;  %v752_v28 = vpop.f32.mrb[21].mxu0  ;;  %v845_v29 = vsel %vm819_vm1, %v840_v3, %v844_v22  ;;  %v4710_v30 = vmax.f32 %v4286_v57, %v843_v25  ;;  %v848_v31 = vrot.slane %v4296_v23, 1 }
 0x144   : > { %v753_v32 = vadd.f32 %v752_v28, %v4640_v49  ;;  %v754_v33 = vpop.f32.mrb[22].mxu0  ;;  %v4713_v34 = vmax.f32 %v4288_v59, %v845_v29  ;;  %v847_v36 = vsel %vm819_vm1, %v842_v18, %v846_v26 }
 0x145   : > { %4305 = vtanh.f32 %v751_v27  ;;  %v755_v37 = vadd.f32 %v754_v33, %v4636_v48  ;;  %v756_v38 = vpop.f32.mrb[23].mxu0  ;;  %v849_v40 = vsel %vm819_vm1, %v844_v22, %v848_v31  ;;  %v4718_v41 = vmax.f32 %v4290_v15, %v847_v36 }
 0x146   : > { %4307 = vtanh.f32 %v753_v32  ;;  %v757_v42 = vadd.f32 %v756_v38, %v4640_v49  ;;  %v3928_v43 = vpack.i.bf16 %v4713_v34, %v4710_v30  ;;  %v4723_v50 = vmax.f32 %v4292_v16, %v849_v40 }
 0x147   : > { %v4298_v51 = vpop.eup %4297  ;;  %4309 = vtanh.f32 %v755_v37 }
 0x148   : > { %v4300_v53 = vpop.eup %4299  ;;  %4311 = vtanh.f32 %v757_v42  ;;  %3929 = vrot.lane.b32.xlu1 %v3928_v43, %s4403_s16  ;;  %v3933_v54 = vpack.i.bf16 %v4723_v50, %v4718_v41  ;;  %v850_v55 = vrot.slane %v4298_v51, 1 }
 0x149   : > { %v4302_v56 = vpop.eup %4301  ;;  %v852_v57 = vrot.slane %v4300_v53, 1 }
 0x14a   : > { %v4304_v58 = vpop.eup %4303  ;;  %v760_v59 = vpop.f32.mrb[24].mxu0  ;;  %3934 = vrot.lane.b32.xlu0 %v3933_v54, %s4403_s16  ;;  %v851_v60 = vsel %vm819_vm1, %v846_v26, %v850_v55  ;;  %v854_v61 = vrot.slane %v4302_v56, 1 }
 0x14b   : > { %v761_v62 = vadd.f32 %v760_v59, %v4636_v48  ;;  %v762_v63 = vpop.f32.mrb[25].mxu0  ;;  %v853_v0 = vsel %vm819_vm1, %v848_v31, %v852_v57  ;;  %v4732_v1 = vmax.f32 %v4294_v20, %v851_v60  ;;  %v856_v3 = vrot.slane %v4304_v58, 1 }
 0x14c   : > { %v763_v4 = vadd.f32 %v762_v63, %v4640_v49  ;;  %v764_v5 = vpop.f32.mrb[26].mxu0  ;;  %v4735_v7 = vmax.f32 %v4296_v23, %v853_v0  ;;  %v855_v8 = vsel %vm819_vm1, %v850_v55, %v854_v61  ;;  %v4404_v60 = vmov 0  }
 0x14d   : > { %4313 = vtanh.f32 %v761_v62  ;;  %v765_v9 = vpop.f32.mrb[27].mxu0  ;;  %v857_v10 = vsel %vm819_vm1, %v852_v57, %v856_v3  ;;  %v4739_v12 = vmax.f32 %v4298_v51, %v855_v8  ;;  %1150 = vmatprep.mubr.bf16.mxu1 %v4404_v60  ;;  %1805 = vmatprep.mubr.bf16.mxu0 %v4404_v60 }
 0x14e   : > { %4315 = vtanh.f32 %v763_v4  ;;  %v3938_v48 = vpack.i.bf16 %v4735_v7, %v4732_v1  ;;  %v4743_v13 = vmax.f32 %v4300_v53, %v857_v10 }
 0x14f   : > { %v4306_v15 = vpop.eup %4305 }
 0x150   : > { %v4308_v16 = vpop.eup %4307  ;;  %3939 = vrot.lane.b32.xlu1 %v3938_v48, %s4403_s16  ;;  %v3943_v49 = vpack.i.bf16 %v4743_v13, %v4739_v12  ;;  %v858_v17 = vrot.slane %v4306_v15, 1 }
 0x151   : > { %v4310_v18 = vpop.eup %4309  ;;  %v860_v20 = vrot.slane %v4308_v16, 1 }
 0x152   : > { %v4312_v22 = vpop.eup %4311  ;;  %3944 = vrot.lane.b32.xlu0 %v3943_v49, %s4403_s16  ;;  %v859_v23 = vsel %vm819_vm1, %v854_v61, %v858_v17  ;;  %v862_v24 = vrot.slane %v4310_v18, 1 }
 0x153   : > { %v861_v25 = vsel %vm819_vm1, %v856_v3, %v860_v20  ;;  %v4751_v26 = vmax.f32 %v4302_v56, %v859_v23  ;;  %v864_v27 = vrot.slane %v4312_v22, 1 }
 0x154   : > { %v4753_v28 = vmax.f32 %v4304_v58, %v861_v25  ;;  %v863_v29 = vsel %vm819_vm1, %v858_v17, %v862_v24 }
 0x155   : > { %v865_v31 = vsel %vm819_vm1, %v860_v20, %v864_v27  ;;  %v4757_v32 = vmax.f32 %v4306_v15, %v863_v29 }
 0x156   : > { %v3948_v33 = vpack.i.bf16 %v4753_v28, %v4751_v26  ;;  %v4761_v36 = vmax.f32 %v4308_v16, %v865_v31 }
 0x157   : > { %v4314_v37 = vpop.eup %4313 }
 0x158   : > { %v4316_v38 = vpop.eup %4315  ;;  %3949 = vrot.lane.b32.xlu1 %v3948_v33, %s4403_s16  ;;  %v3953_v40 = vpack.i.bf16 %v4761_v36, %v4757_v32  ;;  %v866_v42 = vrot.slane %v4314_v37, 1 }
 0x159   : > { %v868_v43 = vrot.slane %v4316_v38, 1 }
 0x15a   : > { %3954 = vrot.lane.b32.xlu0 %v3953_v40, %s4403_s16  ;;  %v4767_v51 = vmax.f32 %v4314_v37, %v866_v42  ;;  %v867_v53 = vsel %vm819_vm1, %v862_v24, %v866_v42 }
 0x15b   : > { %v4770_v54 = vmax.f32 %v4316_v38, %v868_v43  ;;  %v869_v55 = vsel %vm819_vm1, %v864_v27, %v868_v43  ;;  %v4773_v56 = vmax.f32 %v4310_v18, %v867_v53 }
 0x15c   : > { %v4775_v57 = vmax.f32 %v4312_v22, %v869_v55 }
 0x15d   : > { %v3963_v58 = vpack.i.bf16 %v4770_v54, %v4767_v51 }
 0x15e   : > { %v3958_v59 = vpack.i.bf16 %v4775_v57, %v4773_v56 }
 0x15f   : > { %3964 = vrot.lane.b32.xlu0 %v3963_v58, %s4403_s16 }
 0x160   : > { %3959 = vrot.lane.b32.xlu1 %v3958_v59, %s4403_s16 }
 0x1a4   : > { %v3905_v61 = vpop.permute.xlu0 %3904 }
 0x1a5   : > { %v3907_v62 = vunpack.i.h.bf16 %v3905_v61  ;;  %v3906_v63 = vunpack.i.l.bf16 %v3905_v61 }
 0x1a7   : > { %v1001_v3 = vsel %vm1000_vm2, %v3906_v63, %v3907_v62  ;;  %v1041_v9 = vmax.f32 %v4658_v21, %v3907_v62 }
 0x1a8   : > { %v1040_v15 = vmax.f32 %v4655_v19, %v1001_v3 }
 0x1aa   : > { %v3910_v0 = vpop.permute.xlu0 %3909 }
 0x1ab   : > { %v3912_v4 = vunpack.i.h.bf16 %v3910_v0  ;;  %v3911_v5 = vunpack.i.l.bf16 %v3910_v0 }
 0x1ac   : > { %v3915_v8 = vpop.permute.xlu1 %3914 }
 0x1ad   : > { %v1043_v10 = vmax.f32 %v4669_v39, %v3912_v4  ;;  %v1002_v48 = vsel %vm1000_vm2, %v3911_v5, %v3912_v4  ;;  %v3917_v17 = vunpack.i.h.bf16 %v3915_v8  ;;  %v3916_v18 = vunpack.i.l.bf16 %v3915_v8 }
 0x1ae   : > { %v1042_v16 = vmax.f32 %v4666_v35, %v1002_v48 }
 0x1af   : > { %v4791_v49 = vpack.c.bf16 %v1043_v10, %v1041_v9  ;;  %v1003_v21 = vsel %vm1000_vm2, %v3916_v18, %v3917_v17  ;;  %v1045_v23 = vmax.f32 %v4679_v52, %v3917_v17 }
 0x1b0   : > { %v4793_v20 = vpack.c.bf16 %v1042_v16, %v1040_v15  ;;  %v1044_v27 = vmax.f32 %v4674_v46, %v1003_v21 }
 0x1b1   : > { %1118 = vmatprep.subr.bf16.mxu1 %v4791_v49  ;;  %1773 = vmatprep.subr.bf16.mxu0 %v4791_v49 }
 0x1b2   : > { %v3920_v22 = vpop.permute.xlu1 %3919  ;;  %1119 = vmatpush1.bf16.msra.mxu1 %v4793_v20  ;;  %1774 = vmatpush1.bf16.msra.mxu0 %v4793_v20 }
 0x1b3   : > { %v3922_v19 = vunpack.i.h.bf16 %v3920_v22  ;;  %v3921_v39 = vunpack.i.l.bf16 %v3920_v22 }
 0x1b4   : > { %v3925_v35 = vpop.permute.xlu0 %3924 }
 0x1b5   : > { %v1047_v24 = vmax.f32 %v4691_v6, %v3922_v19  ;;  %v1004_v25 = vsel %vm1000_vm2, %v3921_v39, %v3922_v19  ;;  %v3927_v33 = vunpack.i.h.bf16 %v3925_v35  ;;  %v3926_v37 = vunpack.i.l.bf16 %v3925_v35 }
 0x1b6   : > { %v1046_v29 = vmax.f32 %v4688_v2, %v1004_v25 }
 0x1b7   : > { %v4805_v31 = vpack.c.bf16 %v1047_v24, %v1045_v23  ;;  %v1005_v52 = vsel %vm1000_vm2, %v3926_v37, %v3927_v33  ;;  %v1049_v42 = vmax.f32 %v4701_v14, %v3927_v33 }
 0x1b8   : > { %v4807_v38 = vpack.c.bf16 %v1046_v29, %v1044_v27  ;;  %v1048_v55 = vmax.f32 %v4696_v11, %v1005_v52  ;;  %v4405_v27 = vmov 65535  }
 0x1b9   : > { %1120 = vmatprep.subr.bf16.mxu1 %v4805_v31  ;;  %1775 = vmatprep.subr.bf16.mxu0 %v4805_v31  ;;  %v1110_v29 = vsel %vm1108_vm3, 4294967295, %v4405_v27 }
 0x1ba   : > { %v3930_v40 = vpop.permute.xlu1 %3929  ;;  %1121 = vmatpush1.bf16.msra.mxu1 %v4807_v38  ;;  %1776 = vmatpush1.bf16.msra.mxu0 %v4807_v38  ;;  %v4857_v52 = vsel %vm1109_vm4, %v1110_v29, 0  ;;  %v4100_v29 = vld [vmem:[%s5729_s4 + $0x180] ss:$8 sps:$4 sm:$0xff]  }
 0x1bb   : > { %v3932_v46 = vunpack.i.h.bf16 %v3930_v40  ;;  %v3931_v6 = vunpack.i.l.bf16 %v3930_v40 }
 0x1bc   : > { %v3935_v2 = vpop.permute.xlu0 %3934 }
 0x1bd   : > { %v1051_v43 = vmax.f32 %v4713_v34, %v3932_v46  ;;  %v1006_v53 = vsel %vm1000_vm2, %v3931_v6, %v3932_v46  ;;  %v3937_v61 = vunpack.i.h.bf16 %v3935_v2  ;;  %v3936_v62 = vunpack.i.l.bf16 %v3935_v2 }
 0x1be   : > { %v1050_v58 = vmax.f32 %v4710_v30, %v1006_v53 }
 0x1bf   : > { %v4819_v59 = vpack.c.bf16 %v1051_v43, %v1049_v42  ;;  %v1007_v14 = vsel %vm1000_vm2, %v3936_v62, %v3937_v61  ;;  %v1053_v3 = vmax.f32 %v4723_v50, %v3937_v61 }
 0x1c0   : > { %v4821_v63 = vpack.c.bf16 %v1050_v58, %v1048_v55  ;;  %v1052_v8 = vmax.f32 %v4718_v41, %v1007_v14 }
 0x1c1   : > { %1122 = vmatprep.subr.bf16.mxu1 %v4819_v59  ;;  %1777 = vmatprep.subr.bf16.mxu0 %v4819_v59 }
 0x1c2   : > { %v3940_v0 = vpop.permute.xlu1 %3939  ;;  %1123 = vmatpush1.bf16.msra.mxu1 %v4821_v63  ;;  %1778 = vmatpush1.bf16.msra.mxu0 %v4821_v63 }
 0x1c3   : > { %v3942_v11 = vunpack.i.h.bf16 %v3940_v0  ;;  %v3941_v34 = vunpack.i.l.bf16 %v3940_v0 }
 0x1c4   : > { %v3945_v30 = vpop.permute.xlu0 %3944 }
 0x1c5   : > { %v1055_v4 = vmax.f32 %v4735_v7, %v3942_v11  ;;  %v1008_v5 = vsel %vm1000_vm2, %v3941_v34, %v3942_v11  ;;  %v3947_v48 = vunpack.i.h.bf16 %v3945_v30  ;;  %v3946_v15 = vunpack.i.l.bf16 %v3945_v30  ;;  %v4071_v11 = vld [vmem:[%s5729_s4 + $0xe4] ss:$8 sps:$4 sm:$0xff]   ;;  %v4069_v34 = vld [vmem:[%s5729_s4 + $0xe0] ss:$8 sps:$4 sm:$0xff]   ;;  %v4075_v30 = vld [vmem:[%s5729_s4 + $0xf4] ss:$8 sps:$4 sm:$0xff]  }
 0x1c6   : > { %v1054_v9 = vmax.f32 %v4732_v1, %v1008_v5  ;;  %v4073_v5 = vld [vmem:[%s5729_s4 + $0xf0] ss:$8 sps:$4 sm:$0xff]  }
 0x1c7   : > { %v4833_v10 = vpack.c.bf16 %v1055_v4, %v1053_v3  ;;  %v1009_v50 = vsel %vm1000_vm2, %v3946_v15, %v3947_v48  ;;  %v1057_v18 = vmax.f32 %v4743_v13, %v3947_v48  ;;  %v4060_v3 = vld [vmem:[%s5728_s3 + $0x1c] sm:$0xff]   ;;  %v4065_v4 = vld [vmem:[%s5728_s3 + $0x44] sm:$0xff]   ;;  %v4072_v15 = vld [vmem:[%s5728_s3 + $0x4c] ss:$0 sps:$4 sm:$0xff]  }
 0x1c8   : > { %v4835_v16 = vpack.c.bf16 %v1054_v9, %v1052_v8  ;;  %v1056_v19 = vmax.f32 %v4739_v12, %v1009_v50  ;;  %v4078_v8 = vld [vmem:[%s5729_s4 + $0x104] ss:$8 sps:$4 sm:$0xff]   ;;  %v4076_v9 = vld [vmem:[%s5729_s4 + $0x100] ss:$8 sps:$4 sm:$0xff]  }
 0x1c9   : > { %1124 = vmatprep.subr.bf16.mxu1 %v4833_v10  ;;  %1779 = vmatprep.subr.bf16.mxu0 %v4833_v10  ;;  %v4061_v48 = vld [vmem:[%s5728_s3 + $0x24] ss:$0 sps:$4 sm:$0xff]   ;;  %v4082_v50 = vld [vmem:[%s5729_s4 + $0x120] ss:$8 sps:$4 sm:$0xff]  }
 0x1ca   : > { %v3950_v17 = vpop.permute.xlu1 %3949  ;;  %1125 = vmatpush1.bf16.msra.mxu1 %v4835_v16  ;;  %1780 = vmatpush1.bf16.msra.mxu0 %v4835_v16 }
 0x1cb   : > { %v3952_v41 = vunpack.i.h.bf16 %v3950_v17  ;;  %v3951_v7 = vunpack.i.l.bf16 %v3950_v17  ;;  %v4084_v17 = vld [vmem:[%s5729_s4 + $0x124] ss:$8 sps:$4 sm:$0xff]  }
 0x1cc   : > { %v3955_v1 = vpop.permute.xlu0 %3954 }
 0x1cd   : > { %v1059_v22 = vmax.f32 %v4753_v28, %v3952_v41  ;;  %v1010_v21 = vsel %vm1000_vm2, %v3951_v7, %v3952_v41  ;;  %v3957_v23 = vunpack.i.h.bf16 %v3955_v1  ;;  %v3956_v24 = vunpack.i.l.bf16 %v3955_v1  ;;  %v4085_v41 = vld [vmem:[%s5729_s4 + $0x130] ss:$8 sps:$4 sm:$0xff]   ;;  %v4087_v7 = vld [vmem:[%s5729_s4 + $0x134] ss:$8 sps:$4 sm:$0xff]   ;;  %v4090_v1 = vld [vmem:[%s5729_s4 + $0x144] ss:$8 sps:$4 sm:$0xff]  }
 0x1ce   : > { %v1058_v39 = vmax.f32 %v4751_v26, %v1010_v21  ;;  %v4093_v21 = vld [vmem:[%s5729_s4 + $0x154] ss:$8 sps:$4 sm:$0xff]  }
 0x1cf   : > { %v4847_v35 = vpack.c.bf16 %v1059_v22, %v1057_v18  ;;  %v1011_v26 = vsel %vm1000_vm2, %v3956_v24, %v3957_v23  ;;  %v1061_v2 = vmax.f32 %v4761_v36, %v3957_v23  ;;  %v4088_v18 = vld [vmem:[%s5729_s4 + $0x140] ss:$8 sps:$4 sm:$0xff]   ;;  %v4091_v22 = vld [vmem:[%s5729_s4 + $0x150] ss:$8 sps:$4 sm:$0xff]   ;;  %v4099_v23 = vld [vmem:[%s5729_s4 + $0x174] ss:$8 sps:$4 sm:$0xff]  }
 0x1d0   : > { %v4849_v25 = vpack.c.bf16 %v1058_v39, %v1056_v19  ;;  %v1060_v55 = vmax.f32 %v4757_v32, %v1011_v26  ;;  %v4055_v32 = vld [vmem:[%s5728_s3] sm:$0xff]  }
 0x1d1   : > { %v3965_v13 = vpop.permute.xlu0 %3964  ;;  %1126 = vmatprep.subr.bf16.mxu1 %v4847_v35  ;;  %1781 = vmatprep.subr.bf16.mxu0 %v4847_v35  ;;  %v4096_v19 = vld [vmem:[%s5729_s4 + $0x164] ss:$8 sps:$4 sm:$0xff]   ;;  %v4094_v39 = vld [vmem:[%s5729_s4 + $0x160] ss:$8 sps:$4 sm:$0xff]  }
 0x1d2   : > { %v3967_v28 = vunpack.i.h.bf16 %v3965_v13  ;;  %v3966_v12 = vunpack.i.l.bf16 %v3965_v13  ;;  %v3960_v33 = vpop.permute.xlu1 %3959  ;;  %1127 = vmatpush1.bf16.msra.mxu1 %v4849_v25  ;;  %1782 = vmatpush1.bf16.msra.mxu0 %v4849_v25  ;;  %v4102_v24 = vld [vmem:[%s5729_s4 + $0x184] ss:$8 sps:$4 sm:$0xff]  }
 0x1d3   : > { %v3962_v37 = vunpack.i.h.bf16 %v3960_v33  ;;  %v3961_v40 = vunpack.i.l.bf16 %v3960_v33  ;;  %v4108_v26 = vld [vmem:[%s5729_s4 + $0x4] ss:$8 sps:$4 sm:$0xff]  }
 0x1d4   : > { %v1065_v46 = vmax.f32 %v4770_v54, %v3967_v28  ;;  %v1013_v6 = vsel %vm1000_vm2, %v3966_v12, %v3967_v28  ;;  %v4105_v28 = vld [vmem:[%s5729_s4 + $0x194] ss:$8 sps:$4 sm:$0xff]   ;;  %v4103_v12 = vld [vmem:[%s5729_s4 + $0x190] ss:$8 sps:$4 sm:$0xff]  }
 0x1d5   : > { %v1064_v42 = vmax.f32 %v4767_v51, %v1013_v6  ;;  %v1063_v43 = vmax.f32 %v4775_v57, %v3962_v37  ;;  %v1012_v53 = vsel %vm1000_vm2, %v3961_v40, %v3962_v37  ;;  %v4056_v51 = vld [vmem:[%s5728_s3 + $0x28] sm:$0xff]   ;;  %v4062_v57 = vld [vmem:[%s5728_s3 + $0x30] sm:$0xff]  }
 0x1d6   : > { %v1079_v58 = vpack.c.bf16 %v1065_v46, %v1065_v46  ;;  %v1062_v61 = vmax.f32 %v4773_v56, %v1012_v53  ;;  %v4057_v56 = vld [vmem:[%s5728_s3 + $0x8] sm:$0xff]  }
 0x1d7   : > { %v1077_v62 = vpack.c.bf16 %v1063_v43, %v1061_v2  ;;  %v1078_v14 = vpack.c.bf16 %v1064_v42, %v1064_v42 }
 0x1d8   : > { %v1116_v0 = vand.u32 %v4857_v52, %v1079_v58  ;;  %v1076_v54 = vpack.c.bf16 %v1062_v61, %v1060_v55 }
 0x1d9   : > { %1128 = vmatprep.subr.bf16.mxu1 %v1077_v62  ;;  %1783 = vmatprep.subr.bf16.mxu0 %v1077_v62  ;;  %v1113_v36 = vand.u32 %v4857_v52, %v1078_v14 }
 0x1da   : > { %1129 = vmatpush1.bf16.msra.mxu1 %v1076_v54  ;;  %1784 = vmatpush1.bf16.msra.mxu0 %v1076_v54 }
 0x1db   : > { %1130 = vmatprep.subr.bf16.mxu1 %v1116_v0  ;;  %1785 = vmatprep.subr.bf16.mxu0 %v1116_v0 }
 0x1de   : > { %1131 = vmatpush1.bf16.msra.mxu1 %v1113_v36  ;;  %1786 = vmatpush1.bf16.msra.mxu0 %v1113_v36 }
 0x1df   : > { %1239 = vmatprep.subr.bf16.mxu1 %v4791_v49  ;;  %2109 = vmatprep.subr.bf16.mxu0 %v4791_v49  ;;  %v4058_v49 = vld [vmem:[%s5728_s3 + $0x10] ss:$0 sps:$4 sm:$0xff]  }
 0x1e1   : > { %3473 = vmatmul.mubr.msk.bf16.vlgmr.msra.gmra.mrb[0].mxu1 %vm1098_vm5, %v4055_v32  ;;  %3579 = vmatmul.mubr.msk.bf16.vlgmr.msra.gmra.mrb[28].mxu0 %vm1098_vm5, %v4056_v51 }
 0x1e2   : > { %1240 = vmatpush1.bf16.msra.mxu1 %v4793_v20  ;;  %2110 = vmatpush1.bf16.msra.mxu0 %v4793_v20  ;;  %v4063_v20 = vld [vmem:[%s5728_s3 + $0x38] ss:$0 sps:$4 sm:$0xff]  }
 0x1e3   : > { %1241 = vmatprep.subr.bf16.mxu1 %v4805_v31  ;;  %2111 = vmatprep.subr.bf16.mxu0 %v4805_v31  ;;  %v4068_v31 = vld [vmem:[%s5729_s4 + $0xd4] ss:$8 sps:$4 sm:$0xff]  }
 0x1e4   : > { %1160 = vmatprep.mubr.bf16.mxu1 %v4404_v60  ;;  %1815 = vmatprep.mubr.bf16.mxu0 %v4404_v60 }
 0x1e6   : > { %1242 = vmatpush1.bf16.msra.mxu1 %v4807_v38  ;;  %2112 = vmatpush1.bf16.msra.mxu0 %v4807_v38  ;;  %v4059_v38 = vld [vmem:[%s5728_s3 + $0x14] sm:$0xff]  }
 0x1e7   : > { %1243 = vmatprep.subr.bf16.mxu1 %v4819_v59  ;;  %2113 = vmatprep.subr.bf16.mxu0 %v4819_v59  ;;  %v4064_v59 = vld [vmem:[%s5728_s3 + $0x3c] sm:$0xff]  }
 0x1e9   : > { %3474 = vmatmul.mubr.msk.bf16.gmra.mrb[4].mxu1 %vm1098_vm5, %v4057_v56  ;;  %3580 = vmatmul.mubr.msk.bf16.gmra.mrb[32].mxu0 %vm1098_vm5, %v4062_v57 }
 0x1ea   : > { %1244 = vmatpush1.bf16.msra.mxu1 %v4821_v63  ;;  %2114 = vmatpush1.bf16.msra.mxu0 %v4821_v63  ;;  %v4066_v63 = vld [vmem:[%s5729_s4 + $0xd0] ss:$8 sps:$4 sm:$0xff]  }
 0x1eb   : > { %1245 = vmatprep.subr.bf16.mxu1 %v4833_v10  ;;  %2115 = vmatprep.subr.bf16.mxu0 %v4833_v10  ;;  %v4081_v10 = vld [vmem:[%s5729_s4 + $0x114] ss:$8 sps:$4 sm:$0xff]  }
 0x1ec   : > { %1170 = vmatprep.mubr.bf16.mxu1 %v4404_v60  ;;  %1825 = vmatprep.mubr.bf16.mxu0 %v4404_v60 }
 0x1ee   : > { %1246 = vmatpush1.bf16.msra.mxu1 %v4835_v16  ;;  %2116 = vmatpush1.bf16.msra.mxu0 %v4835_v16  ;;  %v4079_v16 = vld [vmem:[%s5729_s4 + $0x110] ss:$8 sps:$4 sm:$0xff]  }
 0x1ef   : > { %1247 = vmatprep.subr.bf16.mxu1 %v4847_v35  ;;  %2117 = vmatprep.subr.bf16.mxu0 %v4847_v35  ;;  %v4097_v35 = vld [vmem:[%s5729_s4 + $0x170] ss:$8 sps:$4 sm:$0xff]  }
 0x1f1   : > { %3475 = vmatmul.mubr.msk.bf16.gmra.mrb[8].mxu1 %vm1098_vm5, %v4058_v49  ;;  %3581 = vmatmul.mubr.msk.bf16.gmra.mrb[36].mxu0 %vm1098_vm5, %v4063_v20 }
 0x1f2   : > { %1248 = vmatpush1.bf16.msra.mxu1 %v4849_v25  ;;  %2118 = vmatpush1.bf16.msra.mxu0 %v4849_v25  ;;  %v1472_v25 = vsel %vm819_vm1, 4294967295, %v4405_v27 }
 0x1f3   : > { %1249 = vmatprep.subr.bf16.mxu1 %v1077_v62  ;;  %2119 = vmatprep.subr.bf16.mxu0 %v1077_v62  ;;  %v5022_v13 = vsel %vm1471_vm6, %v1472_v25, 0  ;;  %v4115_v25 = vld [vmem:[%s5729_s4 + $0x30] ss:$8 sps:$4 sm:$0xff]  }
 0x1f4   : > { %1271 = vmatprep.mubr.bf16.mxu1 %v4404_v60  ;;  %2141 = vmatprep.mubr.bf16.mxu0 %v4404_v60  ;;  %v1478_v33 = vand.u32 %v4105_v28, %v5022_v13  ;;  %v1475_v27 = vand.u32 %v4103_v12, %v5022_v13  ;;  %v4120_v28 = vld [vmem:[%s5729_s4 + $0x44] ss:$8 sps:$4 sm:$0xff]  }
 0x1f6   : > { %1250 = vmatpush1.bf16.msra.mxu1 %v1076_v54  ;;  %2120 = vmatpush1.bf16.msra.mxu0 %v1076_v54 }
 0x1f7   : > { %1251 = vmatprep.subr.bf16.mxu1 %v1116_v0  ;;  %2121 = vmatprep.subr.bf16.mxu0 %v1116_v0 }
 0x1fa   : > { %1252 = vmatpush1.bf16.msra.mxu1 %v1113_v36  ;;  %2122 = vmatpush1.bf16.msra.mxu0 %v1113_v36 }
 0x1fb   : > { %1480 = vmatprep.subr.bf16.mxu1 %v4068_v31 }
 0x1fd   : > { %3484 = vmatmul.mubr.msk.bf16.vlgmr.msra.gmra.mrb[12].mxu1 %vm1098_vm5, %v4059_v38  ;;  %3645 = vmatmul.mubr.msk.bf16.vlgmr.msra.gmra.mrb[40].mxu0 %vm1098_vm5, %v4064_v59 }
 0x1fe   : > { %1281 = vmatprep.mubr.bf16.mxu1 %v4404_v60  ;;  %2151 = vmatprep.mubr.bf16.mxu0 %v4404_v60 }
 0x1ff   : > { %1481 = vmatpush1.bf16.msra.mxu1 %v4066_v63 }
 0x200   : > { %1482 = vmatprep.subr.bf16.mxu1 %v4071_v11 }
 0x203   : > { %1483 = vmatpush1.bf16.msra.mxu1 %v4069_v34 }
 0x204   : > { %1484 = vmatprep.subr.bf16.mxu1 %v4075_v30 }
 0x205   : > { %3485 = vmatmul.mubr.msk.bf16.gmra.mrb[16].mxu1 %vm1098_vm5, %v4060_v3  ;;  %3646 = vmatmul.mubr.msk.bf16.gmra.mrb[44].mxu0 %vm1098_vm5, %v4065_v4 }
 0x206   : > { %1291 = vmatprep.mubr.bf16.mxu1 %v4404_v60  ;;  %2161 = vmatprep.mubr.bf16.mxu0 %v4404_v60 }
 0x207   : > { %1485 = vmatpush1.bf16.msra.mxu1 %v4073_v5 }
 0x208   : > { %1486 = vmatprep.subr.bf16.mxu1 %v4078_v8 }
 0x20b   : > { %1487 = vmatpush1.bf16.msra.mxu1 %v4076_v9 }
 0x20c   : > { %1488 = vmatprep.subr.bf16.mxu1 %v4081_v10 }
 0x20d   : > { %3486 = vmatmul.mubr.msk.bf16.gmra.mrb[20].mxu1 %vm1098_vm5, %v4061_v48  ;;  %3647 = vmatmul.mubr.msk.bf16.gmra.mrb[48].mxu0 %vm1098_vm5, %v4072_v15 }
 0x20e   : > { %2601 = vmatprep.mubr.bf16.mxu0 %v4404_v60 }
 0x20f   : > { %1489 = vmatpush1.bf16.msra.mxu1 %v4079_v16 }
 0x210   : > { %1490 = vmatprep.subr.bf16.mxu1 %v4084_v17  ;;  %v4106_v17 = vld [vmem:[%s5729_s4] ss:$8 sps:$4 sm:$0xff]  }
 0x213   : > { %1491 = vmatpush1.bf16.msra.mxu1 %v4082_v50  ;;  %v4111_v50 = vld [vmem:[%s5729_s4 + $0x14] ss:$8 sps:$4 sm:$0xff]  }
 0x214   : > { %1492 = vmatprep.subr.bf16.mxu1 %v4087_v7  ;;  %v4109_v7 = vld [vmem:[%s5729_s4 + $0x10] ss:$8 sps:$4 sm:$0xff]  }
 0x217   : > { %1493 = vmatpush1.bf16.msra.mxu1 %v4085_v41 }
 0x218   : > { %1494 = vmatprep.subr.bf16.mxu1 %v4090_v1 }
 0x21b   : > { %1495 = vmatpush1.bf16.msra.mxu1 %v4088_v18  ;;  %v4114_v18 = vld [vmem:[%s5729_s4 + $0x24] ss:$8 sps:$4 sm:$0xff]  }
 0x21c   : > { %1496 = vmatprep.subr.bf16.mxu1 %v4093_v21 }
 0x21f   : > { %1497 = vmatpush1.bf16.msra.mxu1 %v4091_v22 }
 0x220   : > { %1498 = vmatprep.subr.bf16.mxu1 %v4096_v19 }
 0x223   : > { %1499 = vmatpush1.bf16.msra.mxu1 %v4094_v39 }
 0x224   : > { %1500 = vmatprep.subr.bf16.mxu1 %v4099_v23  ;;  %v4117_v23 = vld [vmem:[%s5729_s4 + $0x34] ss:$8 sps:$4 sm:$0xff]  }
 0x227   : > { %1501 = vmatpush1.bf16.msra.mxu1 %v4097_v35  ;;  %v4112_v35 = vld [vmem:[%s5729_s4 + $0x20] ss:$8 sps:$4 sm:$0xff]  }
 0x228   : > { %1502 = vmatprep.subr.bf16.mxu1 %v4102_v24 }
 0x22b   : > { %1503 = vmatpush1.bf16.msra.mxu1 %v4100_v29 }
 0x22c   : > { %1504 = vmatprep.subr.bf16.mxu1 %v1478_v33 }
 0x22f   : > { %1505 = vmatpush1.bf16.msra.mxu1 %v1475_v27 }
 0x230   : > { %1684 = vmatprep.subr.bf16.mxu1 %v4108_v26 }
 0x2b4   : > { %v5035_v37 = vpop.f32.mrb[0].mxu1  ;;  %v5037_v40 = vpop.f32.mrb[28].mxu0 }
 0x2b5   : > { %v5039_v46 = vpop.f32.mrb[1].mxu1  ;;  %v5041_v6 = vpop.f32.mrb[29].mxu0 }
 0x2b6   : > { %v5043_v2 = vpop.f32.mrb[2].mxu1  ;;  %v5045_v42 = vpop.f32.mrb[30].mxu0 }
 0x2b7   : > { %v1179_v43 = vpack.c.bf16 %v5043_v2, %v5035_v37  ;;  %v5049_v53 = vpop.f32.mrb[3].mxu1  ;;  %v1834_v55 = vpack.c.bf16 %v5045_v42, %v5037_v40  ;;  %v5055_v61 = vpop.f32.mrb[31].mxu0  ;;  %v4151_v37 = vld [vmem:[%s5729_s4 + $0x1c0] ss:$8 sps:$4 sm:$0xff]   ;;  %v4156_v2 = vld [vmem:[%s5729_s4 + $0x1d4] ss:$8 sps:$4 sm:$0xff]  }
 0x2b8   : > { %v1180_v58 = vpack.c.bf16 %v5049_v53, %v5039_v46  ;;  %v1835_v62 = vpack.c.bf16 %v5055_v61, %v5041_v6  ;;  %v4166_v6 = vld [vmem:[%s5729_s4 + $0x210] ss:$8 sps:$4 sm:$0xff]   ;;  %v4171_v61 = vld [vmem:[%s5729_s4 + $0x224] ss:$8 sps:$4 sm:$0xff]  }
 0x2b9   : > { %v4190_v40 = vld [vmem:[%s5729_s4 + $0x290] ss:$8 sps:$4 sm:$0xff]  }
 0x2bc   : > { %v5059_v0 = vpop.f32.mrb[4].mxu1  ;;  %v5069_v51 = vpop.f32.mrb[32].mxu0 }
 0x2bd   : > { %v5061_v14 = vpop.f32.mrb[5].mxu1  ;;  %v5073_v57 = vpop.f32.mrb[33].mxu0 }
 0x2be   : > { %v5063_v54 = vpop.f32.mrb[6].mxu1  ;;  %v5075_v49 = vpop.f32.mrb[34].mxu0 }
 0x2bf   : > { %v1181_v36 = vpack.c.bf16 %v5063_v54, %v5059_v0  ;;  %v5067_v32 = vpop.f32.mrb[7].mxu1  ;;  %v1836_v20 = vpack.c.bf16 %v5075_v49, %v5069_v51  ;;  %v5079_v31 = vpop.f32.mrb[35].mxu0  ;;  %v4162_v54 = vld [vmem:[%s5729_s4 + $0x1f4] ss:$8 sps:$4 sm:$0xff]   ;;  %v4196_v51 = vld [vmem:[%s5729_s4 + $0x2b0] ss:$8 sps:$4 sm:$0xff]  }
 0x2c0   : > { %v1182_v56 = vpack.c.bf16 %v5067_v32, %v5061_v14  ;;  %v1837_v38 = vpack.c.bf16 %v5079_v31, %v5073_v57  ;;  %v4154_v14 = vld [vmem:[%s5729_s4 + $0x1d0] ss:$8 sps:$4 sm:$0xff]   ;;  %v4159_v32 = vld [vmem:[%s5729_s4 + $0x1e4] ss:$8 sps:$4 sm:$0xff]   ;;  %v4193_v57 = vld [vmem:[%s5729_s4 + $0x2a0] ss:$8 sps:$4 sm:$0xff]  }
 0x2c1   : > { %v4198_v31 = vld [vmem:[%s5729_s4 + $0x2b4] ss:$8 sps:$4 sm:$0xff]   ;;  %v4201_v49 = vld [vmem:[%s5729_s4 + $0x2c4] ss:$8 sps:$4 sm:$0xff]  }
 0x2c4   : > { %v5083_v59 = vpop.f32.mrb[8].mxu1  ;;  %v5087_v30 = vpop.f32.mrb[36].mxu0 }
 0x2c5   : > { %v5085_v63 = vpop.f32.mrb[9].mxu1  ;;  %v5089_v3 = vpop.f32.mrb[37].mxu0  ;;  %v1183_v0 = vpack.c.bf16 %v5083_v59, %v5083_v59  ;;  %v4165_v59 = vld [vmem:[%s5729_s4 + $0x204] ss:$8 sps:$4 sm:$0xff]  }
 0x2c6   : > { %v1176_v11 = vpop.f32.mrb[10].mxu1  ;;  %v1831_v4 = vpop.f32.mrb[38].mxu0  ;;  %v1839_v42 = vpack.c.bf16 %v5089_v3, %v5089_v3  ;;  %v4202_v3 = vld [vmem:[%s5729_s4 + $0x2d0] ss:$8 sps:$4 sm:$0xff]  }
 0x2c7   : > { %v1177_v34 = vpop.f32.mrb[11].mxu1  ;;  %v1832_v5 = vpop.f32.mrb[39].mxu0  ;;  %v4118_v11 = vld [vmem:[%s5729_s4 + $0x40] ss:$8 sps:$4 sm:$0xff]   ;;  %v4121_v4 = vld [vmem:[%s5729_s4 + $0x50] ss:$8 sps:$4 sm:$0xff]  }
 0x2c8   : > { %v4123_v34 = vld [vmem:[%s5729_s4 + $0x54] ss:$8 sps:$4 sm:$0xff]  }
 0x2d0   : > { %v1273_v8 = vpop.f32.mrb[12].mxu1  ;;  %v5131_v5 = vpop.f32.mrb[40].mxu0 }
 0x2d1   : > { %v1275_v9 = vpop.f32.mrb[13].mxu1 }
 0x2d2   : > { %v1277_v10 = vpop.f32.mrb[14].mxu1 }
 0x2d3   : > { %v1300_v48 = vpack.c.bf16 %v1277_v10, %v1273_v8  ;;  %v1279_v15 = vpop.f32.mrb[15].mxu1  ;;  %v4126_v8 = vld [vmem:[%s5729_s4 + $0x64] ss:$8 sps:$4 sm:$0xff]  }
 0x2d4   : > { %v1301_v16 = vpack.c.bf16 %v1279_v15, %v1275_v9  ;;  %v5136_v9 = vpop.f32.mrb[41].mxu0  ;;  %v4129_v15 = vld [vmem:[%s5729_s4 + $0x74] ss:$8 sps:$4 sm:$0xff]  }
 0x2d5   : > { %v5138_v10 = vpop.f32.mrb[42].mxu0 }
 0x2d6   : > { %3539 = vmatprep.mubr.msk.bf16.mxu1 %vm1461_vm7, %v1301_v16  ;;  %v2170_v46 = vpack.c.bf16 %v5138_v10, %v5131_v5  ;;  %v5142_v53 = vpop.f32.mrb[43].mxu0  ;;  %v4127_v16 = vld [vmem:[%s5729_s4 + $0x70] ss:$8 sps:$4 sm:$0xff]  }
 0x2d7   : > { %1513 = vmatmul.mubr.bf16.vlgmr.msra.gmra.mrb[24].mxu1 %v1300_v48  ;;  %v2171_v48 = vpack.c.bf16 %v5142_v53, %v5136_v9  ;;  %v4205_v9 = vld [vmem:[%s5729_s4 + $0x2e0] ss:$8 sps:$4 sm:$0xff]   ;;  %v4210_v53 = vld [vmem:[%s5729_s4 + $0x2f4] ss:$8 sps:$4 sm:$0xff]  }
 0x2d8   : > { %1685 = vmatpush1.bf16.msra.mxu1 %v4106_v17  ;;  %v1283_v41 = vpop.f32.mrb[16].mxu1  ;;  %v5155_v17 = vpop.f32.mrb[44].mxu0 }
 0x2d9   : > { %v1285_v1 = vpop.f32.mrb[17].mxu1  ;;  %1686 = vmatprep.subr.bf16.mxu1 %v4111_v50  ;;  %v4132_v50 = vld [vmem:[%s5729_s4 + $0x84] ss:$8 sps:$4 sm:$0xff]  }
 0x2da   : > { %v1287_v22 = vpop.f32.mrb[18].mxu1 }
 0x2db   : > { %v1302_v21 = vpack.c.bf16 %v1287_v22, %v1283_v41  ;;  %v1289_v19 = vpop.f32.mrb[19].mxu1  ;;  %v5160_v41 = vpop.f32.mrb[45].mxu0  ;;  %v4130_v22 = vld [vmem:[%s5729_s4 + $0x80] ss:$8 sps:$4 sm:$0xff]  }
 0x2dc   : > { %v1303_v39 = vpack.c.bf16 %v1289_v19, %v1285_v1  ;;  %1687 = vmatpush1.bf16.msra.mxu1 %v4109_v7  ;;  %v5162_v7 = vpop.f32.mrb[46].mxu0 }
 0x2dd   : > { %1688 = vmatprep.subr.bf16.mxu1 %v4114_v18  ;;  %v2172_v1 = vpack.c.bf16 %v5162_v7, %v5155_v17  ;;  %v5166_v18 = vpop.f32.mrb[47].mxu0 }
 0x2de   : > { %3540 = vmatprep.mubr.msk.bf16.mxu1 %vm1461_vm7, %v1303_v39  ;;  %v4135_v39 = vld [vmem:[%s5729_s4 + $0x94] ss:$8 sps:$4 sm:$0xff]  }
 0x2df   : > { %1523 = vmatmul.mubr.bf16.gmra.mrb[28].mxu1 %v1302_v21  ;;  %v2173_v21 = vpack.c.bf16 %v5166_v18, %v5160_v41 }
 0x2e0   : > { %1689 = vmatpush1.bf16.msra.mxu1 %v4112_v35  ;;  %v1293_v24 = vpop.f32.mrb[20].mxu1  ;;  %v5173_v19 = vpop.f32.mrb[48].mxu0  ;;  %v4133_v35 = vld [vmem:[%s5729_s4 + $0x90] ss:$8 sps:$4 sm:$0xff]  }
 0x2e1   : > { %1690 = vmatprep.subr.bf16.mxu1 %v4117_v23  ;;  %v1295_v29 = vpop.f32.mrb[21].mxu1  ;;  %v1304_v27 = vpack.c.bf16 %v1293_v24, %v1293_v24  ;;  %v4138_v23 = vld [vmem:[%s5729_s4 + $0xa4] ss:$8 sps:$4 sm:$0xff]   ;;  %v5184_v24 = vpop.f32.mrb[49].mxu0 }
 0x2e2   : > { %v1305_v12 = vpack.c.bf16 %v1295_v29, %v1295_v29  ;;  %v1297_v33 = vpop.f32.mrb[22].mxu1  ;;  %v2167_v29 = vpop.f32.mrb[50].mxu0 }
 0x2e3   : > { %v1298_v26 = vpop.f32.mrb[23].mxu1  ;;  %v2168_v33 = vpop.f32.mrb[51].mxu0  ;;  %v4183_v29 = vld [vmem:[%s5729_s4 + $0x264] ss:$8 sps:$4 sm:$0xff]  }
 0x2e4   : > { %1691 = vmatpush1.bf16.msra.mxu1 %v4115_v25  ;;  %3541 = vmatprep.mubr.msk.bf16.mxu1 %vm1461_vm7, %v1305_v12  ;;  %v4136_v25 = vld [vmem:[%s5729_s4 + $0xa0] ss:$8 sps:$4 sm:$0xff]   ;;  %v4144_v12 = vld [vmem:[%s5729_s4 + $0xc4] ss:$8 sps:$4 sm:$0xff]   ;;  %v2008_v33 = vand.u32 %v4183_v29, %v5022_v13 }
 0x2e5   : > { %1692 = vmatprep.subr.bf16.mxu1 %v4120_v28  ;;  %v4141_v28 = vld [vmem:[%s5729_s4 + $0xb4] ss:$8 sps:$4 sm:$0xff]   ;;  %v4142_v26 = vld [vmem:[%s5729_s4 + $0xc0] ss:$8 sps:$4 sm:$0xff]  }
 0x2e7   : > { %1533 = vmatmul.mubr.bf16.gmra.mrb[32].mxu1 %v1304_v27  ;;  %v4139_v27 = vld [vmem:[%s5729_s4 + $0xb0] ss:$8 sps:$4 sm:$0xff]  }
 0x2e8   : > { %1693 = vmatpush1.bf16.msra.mxu1 %v4118_v11  ;;  %3568 = vmatprep.mubr.msk.bf16.mxu1 %vm1461_vm7, %v1180_v58  ;;  %v4124_v58 = vld [vmem:[%s5729_s4 + $0x60] ss:$8 sps:$4 sm:$0xff]   ;;  %v1682_v11 = vand.u32 %v4144_v12, %v5022_v13 }
 0x2e9   : > { %1694 = vmatprep.subr.bf16.mxu1 %v4123_v34  ;;  %v1679_v34 = vand.u32 %v4142_v26, %v5022_v13  ;;  %v4181_v12 = vld [vmem:[%s5729_s4 + $0x260] ss:$8 sps:$4 sm:$0xff]   ;;  %v4186_v26 = vld [vmem:[%s5729_s4 + $0x274] ss:$8 sps:$4 sm:$0xff]  }
 0x2ec   : > { %1695 = vmatpush1.bf16.msra.mxu1 %v4121_v4  ;;  %v4147_v4 = vld [vmem:[%s5729_s4 + $0x1a4] ss:$8 sps:$4 sm:$0xff]  }
 0x2ed   : > { %1696 = vmatprep.subr.bf16.mxu1 %v4126_v8  ;;  %v4145_v8 = vld [vmem:[%s5729_s4 + $0x1a0] ss:$8 sps:$4 sm:$0xff]  }
 0x2f0   : > { %1697 = vmatpush1.bf16.msra.mxu1 %v4124_v58  ;;  %v4150_v58 = vld [vmem:[%s5729_s4 + $0x1b4] ss:$8 sps:$4 sm:$0xff]  }
 0x2f1   : > { %1698 = vmatprep.subr.bf16.mxu1 %v4129_v15  ;;  %v4148_v15 = vld [vmem:[%s5729_s4 + $0x1b0] ss:$8 sps:$4 sm:$0xff]  }
 0x2f4   : > { %1699 = vmatpush1.bf16.msra.mxu1 %v4127_v16  ;;  %v4153_v16 = vld [vmem:[%s5729_s4 + $0x1c4] ss:$8 sps:$4 sm:$0xff]  }
 0x2f5   : > { %1700 = vmatprep.subr.bf16.mxu1 %v4132_v50  ;;  %v4168_v50 = vld [vmem:[%s5729_s4 + $0x214] ss:$8 sps:$4 sm:$0xff]  }
 0x2f8   : > { %1701 = vmatpush1.bf16.msra.mxu1 %v4130_v22  ;;  %v4174_v22 = vld [vmem:[%s5729_s4 + $0x234] ss:$8 sps:$4 sm:$0xff]  }
 0x2f9   : > { %1702 = vmatprep.subr.bf16.mxu1 %v4135_v39  ;;  %v4172_v39 = vld [vmem:[%s5729_s4 + $0x230] ss:$8 sps:$4 sm:$0xff]  }
 0x2fc   : > { %1703 = vmatpush1.bf16.msra.mxu1 %v4133_v35  ;;  %v4177_v35 = vld [vmem:[%s5729_s4 + $0x244] ss:$8 sps:$4 sm:$0xff]  }
 0x2fd   : > { %1704 = vmatprep.subr.bf16.mxu1 %v4138_v23  ;;  %v4175_v23 = vld [vmem:[%s5729_s4 + $0x240] ss:$8 sps:$4 sm:$0xff]  }
 0x300   : > { %1705 = vmatpush1.bf16.msra.mxu1 %v4136_v25  ;;  %v4180_v25 = vld [vmem:[%s5729_s4 + $0x254] ss:$8 sps:$4 sm:$0xff]  }
 0x301   : > { %1706 = vmatprep.subr.bf16.mxu1 %v4141_v28  ;;  %v4178_v28 = vld [vmem:[%s5729_s4 + $0x250] ss:$8 sps:$4 sm:$0xff]  }
 0x304   : > { %1707 = vmatpush1.bf16.msra.mxu1 %v4139_v27  ;;  %v2005_v27 = vand.u32 %v4181_v12, %v5022_v13 }
 0x305   : > { %1708 = vmatprep.subr.bf16.mxu1 %v1682_v11  ;;  %v4184_v11 = vld [vmem:[%s5729_s4 + $0x270] ss:$8 sps:$4 sm:$0xff]  }
 0x308   : > { %1709 = vmatpush1.bf16.msra.mxu1 %v1679_v34  ;;  %v4189_v34 = vld [vmem:[%s5729_s4 + $0x284] ss:$8 sps:$4 sm:$0xff]  }
 0x309   : > { %2010 = vmatprep.subr.bf16.mxu1 %v4147_v4  ;;  %v4187_v4 = vld [vmem:[%s5729_s4 + $0x280] ss:$8 sps:$4 sm:$0xff]  }
 0x30b   : > { %1717 = vmatmul.mubr.bf16.vlgmr.msra.gmra.mrb[24].mxu1 %v1179_v43  ;;  %v1184_v43 = vpack.c.bf16 %v5085_v63, %v5085_v63  ;;  %v4163_v63 = vld [vmem:[%s5729_s4 + $0x200] ss:$8 sps:$4 sm:$0xff]  }
 0x30c   : > { %3569 = vmatprep.mubr.msk.bf16.mxu1 %vm1461_vm7, %v1182_v56  ;;  %2011 = vmatpush1.bf16.msra.mxu1 %v4145_v8  ;;  %v4157_v56 = vld [vmem:[%s5729_s4 + $0x1e0] ss:$8 sps:$4 sm:$0xff]   ;;  %v4192_v8 = vld [vmem:[%s5729_s4 + $0x294] ss:$8 sps:$4 sm:$0xff]  }
 0x30d   : > { %2012 = vmatprep.subr.bf16.mxu1 %v4150_v58  ;;  %v4207_v58 = vld [vmem:[%s5729_s4 + $0x2e4] ss:$8 sps:$4 sm:$0xff]  }
 0x310   : > { %2013 = vmatpush1.bf16.msra.mxu1 %v4148_v15  ;;  %v4213_v15 = vld [vmem:[%s5729_s4 + $0x304] ss:$8 sps:$4 sm:$0xff]  }
 0x311   : > { %2014 = vmatprep.subr.bf16.mxu1 %v4153_v16  ;;  %v4211_v16 = vld [vmem:[%s5729_s4 + $0x300] ss:$8 sps:$4 sm:$0xff]  }
 0x313   : > { %1727 = vmatmul.mubr.bf16.gmra.mrb[28].mxu1 %v1181_v36  ;;  %v4160_v36 = vld [vmem:[%s5729_s4 + $0x1f0] ss:$8 sps:$4 sm:$0xff]  }
 0x314   : > { %3570 = vmatprep.mubr.msk.bf16.mxu1 %vm1461_vm7, %v1184_v43  ;;  %2015 = vmatpush1.bf16.msra.mxu1 %v4151_v37  ;;  %v4216_v37 = vld [vmem:[%s5729_s4 + $0x314] ss:$8 sps:$4 sm:$0xff]   ;;  %v4219_v43 = vld [vmem:[%s5729_s4 + $0x324] ss:$8 sps:$4 sm:$0xff]  }
 0x315   : > { %2016 = vmatprep.subr.bf16.mxu1 %v4156_v2  ;;  %v4214_v2 = vld [vmem:[%s5729_s4 + $0x310] ss:$8 sps:$4 sm:$0xff]  }
 0x318   : > { %2017 = vmatpush1.bf16.msra.mxu1 %v4154_v14  ;;  %v4222_v14 = vld [vmem:[%s5729_s4 + $0x334] ss:$8 sps:$4 sm:$0xff]  }
 0x319   : > { %2018 = vmatprep.subr.bf16.mxu1 %v4159_v32  ;;  %v4217_v32 = vld [vmem:[%s5729_s4 + $0x320] ss:$8 sps:$4 sm:$0xff]  }
 0x31b   : > { %1737 = vmatmul.mubr.bf16.gmra.mrb[36].mxu1 %v1183_v0  ;;  %v2344_v0 = vand.u32 %v4222_v14, %v5022_v13 }
 0x31c   : > { %2019 = vmatpush1.bf16.msra.mxu1 %v4157_v56  ;;  %3634 = vmatprep.mubr.msk.bf16.mxu1 %vm1461_vm7, %v1835_v62  ;;  %v4169_v62 = vld [vmem:[%s5729_s4 + $0x220] ss:$8 sps:$4 sm:$0xff]   ;;  %v4220_v56 = vld [vmem:[%s5729_s4 + $0x330] ss:$8 sps:$4 sm:$0xff]  }
 0x31d   : > { %2020 = vmatprep.subr.bf16.mxu1 %v4162_v54  ;;  %v2341_v54 = vand.u32 %v4220_v56, %v5022_v13 }
 0x320   : > { %2021 = vmatpush1.bf16.msra.mxu1 %v4160_v36  ;;  %v2175_v36 = vpack.c.bf16 %v5184_v24, %v5184_v24 }
 0x321   : > { %2022 = vmatprep.subr.bf16.mxu1 %v4165_v59  ;;  %v2174_v59 = vpack.c.bf16 %v5173_v19, %v5173_v19  ;;  %v2417_v19 = vld [vmem:[%s5730_s5] sm:$0x3] }
 0x324   : > { %2023 = vmatpush1.bf16.msra.mxu1 %v4163_v63 }
 0x325   : > { %2024 = vmatprep.subr.bf16.mxu1 %v4168_v50 }
 0x328   : > { %2025 = vmatpush1.bf16.msra.mxu1 %v4166_v6 }
 0x329   : > { %2026 = vmatprep.subr.bf16.mxu1 %v4171_v61 }
 0x32c   : > { %2027 = vmatpush1.bf16.msra.mxu1 %v4169_v62 }
 0x32d   : > { %2028 = vmatprep.subr.bf16.mxu1 %v4174_v22 }
 0x330   : > { %2029 = vmatpush1.bf16.msra.mxu1 %v4172_v39  ;;  %v2422_v39 = vrot.slane %v2417_v19, %v436_v45 }
 0x331   : > { %2030 = vmatprep.subr.bf16.mxu1 %v4177_v35  ;;  %v2426_v35 = vrot.slane %v2417_v19, %v440_v47 }
 0x334   : > { %2031 = vmatpush1.bf16.msra.mxu1 %v4175_v23 }
 0x335   : > { %2032 = vmatprep.subr.bf16.mxu1 %v4180_v25 }
 0x338   : > { %2033 = vmatpush1.bf16.msra.mxu1 %v4178_v28 }
 0x339   : > { %2034 = vmatprep.subr.bf16.mxu1 %v2008_v33 }
 0x33c   : > { %2035 = vmatpush1.bf16.msra.mxu1 %v2005_v27 }
 0x33d   : > { %2346 = vmatprep.subr.bf16.mxu1 %v4186_v26 }
 0x33f   : > { %2043 = vmatmul.mubr.bf16.vlgmr.msra.gmra.mrb[24].mxu1 %v1834_v55  ;;  %v4195_v55 = vld [vmem:[%s5729_s4 + $0x2a4] ss:$8 sps:$4 sm:$0xff]  }
 0x340   : > { %2347 = vmatpush1.bf16.msra.mxu1 %v4184_v11  ;;  %3635 = vmatprep.mubr.msk.bf16.mxu1 %vm1461_vm7, %v1837_v38  ;;  %v1838_v38 = vpack.c.bf16 %v5087_v30, %v5087_v30  ;;  %v4204_v30 = vld [vmem:[%s5729_s4 + $0x2d4] ss:$8 sps:$4 sm:$0xff]  }
 0x341   : > { %2348 = vmatprep.subr.bf16.mxu1 %v4189_v34 }
 0x344   : > { %2349 = vmatpush1.bf16.msra.mxu1 %v4187_v4 }
 0x345   : > { %2350 = vmatprep.subr.bf16.mxu1 %v4192_v8 }
 0x347   : > { %2053 = vmatmul.mubr.bf16.gmra.mrb[28].mxu1 %v1836_v20  ;;  %v4199_v20 = vld [vmem:[%s5729_s4 + $0x2c0] ss:$8 sps:$4 sm:$0xff]  }
 0x348   : > { %2351 = vmatpush1.bf16.msra.mxu1 %v4190_v40  ;;  %3636 = vmatprep.mubr.msk.bf16.mxu1 %vm1461_vm7, %v1839_v42 }
 0x349   : > { %2352 = vmatprep.subr.bf16.mxu1 %v4195_v55 }
 0x34c   : > { %2353 = vmatpush1.bf16.msra.mxu1 %v4193_v57 }
 0x34d   : > { %2354 = vmatprep.subr.bf16.mxu1 %v4198_v31 }
 0x34f   : > { %2063 = vmatmul.mubr.bf16.gmra.mrb[40].mxu1 %v1838_v38 }
 0x350   : > { %2355 = vmatpush1.bf16.msra.mxu1 %v4196_v51  ;;  %3700 = vmatprep.mubr.msk.bf16.mxu1 %vm1461_vm7, %v2171_v48  ;;  %v4208_v48 = vld [vmem:[%s5729_s4 + $0x2f0] ss:$8 sps:$4 sm:$0xff]  }
 0x351   : > { %2356 = vmatprep.subr.bf16.mxu1 %v4201_v49 }
 0x354   : > { %2357 = vmatpush1.bf16.msra.mxu1 %v4199_v20 }
 0x355   : > { %2358 = vmatprep.subr.bf16.mxu1 %v4204_v30 }
 0x358   : > { %2359 = vmatpush1.bf16.msra.mxu1 %v4202_v3 }
 0x359   : > { %2360 = vmatprep.subr.bf16.mxu1 %v4207_v58 }
 0x35c   : > { %2361 = vmatpush1.bf16.msra.mxu1 %v4205_v9 }
 0x35d   : > { %2362 = vmatprep.subr.bf16.mxu1 %v4210_v53 }
 0x360   : > { %2363 = vmatpush1.bf16.msra.mxu1 %v4208_v48 }
 0x361   : > { %2364 = vmatprep.subr.bf16.mxu1 %v4213_v15 }
 0x364   : > { %2365 = vmatpush1.bf16.msra.mxu1 %v4211_v16 }
 0x365   : > { %2366 = vmatprep.subr.bf16.mxu1 %v4216_v37 }
 0x368   : > { %2367 = vmatpush1.bf16.msra.mxu1 %v4214_v2 }
 0x369   : > { %2368 = vmatprep.subr.bf16.mxu1 %v4219_v43 }
 0x36c   : > { %2369 = vmatpush1.bf16.msra.mxu1 %v4217_v32 }
 0x36d   : > { %2370 = vmatprep.subr.bf16.mxu1 %v2344_v0 }
 0x370   : > { %2371 = vmatpush1.bf16.msra.mxu1 %v2341_v54 }
 0x371   : > { %3046 = vmatprep.subr.bf16.mxu1 %v4404_v60 }
 0x373   : > { %2379 = vmatmul.mubr.bf16.vlgmr.msra.gmra.mrb[24].mxu1 %v2170_v46 }
 0x374   : > { %3701 = vmatprep.mubr.msk.bf16.mxu1 %vm1461_vm7, %v2173_v21 }
 0x37b   : > { %2389 = vmatmul.mubr.bf16.gmra.mrb[28].mxu1 %v2172_v1 }
 0x37c   : > { %3702 = vmatprep.mubr.msk.bf16.mxu1 %vm1461_vm7, %v2175_v36 }
 0x383   : > { %2399 = vmatmul.mubr.bf16.gmra.mrb[44].mxu1 %v2174_v59 }
 0x3ba   : > { %v1534_v5 = vpop.f32.mrb[32].mxu1 }
 0x3bb   : > { %v1536_v10 = vpop.f32.mrb[33].mxu1 }
 0x3bc   : > { %v1538_v46 = vpop.f32.mrb[34].mxu1 }
 0x3bd   : > { %v1539_v63 = vpop.f32.mrb[35].mxu1 }
 0x3ee   : > { %v1738_v41 = vpop.f32.mrb[36].mxu1 }
 0x3ef   : > { %v1739_v18 = vadd.f32 %v1738_v41, %v1534_v5  ;;  %v1740_v21 = vpop.f32.mrb[37].mxu1 }
 0x3f0   : > { %v1741_v50 = vadd.f32 %v1740_v21, %v1536_v10  ;;  %v1742_v6 = vpop.f32.mrb[38].mxu1 }
 0x3f1   : > { %v1743_v24 = vpop.f32.mrb[39].mxu1 }
 0x422   : > { %v2064_v61 = vpop.f32.mrb[40].mxu1 }
 0x423   : > { %v2079_v62 = vadd.f32 %v2064_v61, %v1739_v18  ;;  %v2066_v17 = vpop.f32.mrb[41].mxu1 }
 0x424   : > { %v2080_v7 = vadd.f32 %v2066_v17, %v1741_v50  ;;  %v2068_v1 = vpop.f32.mrb[42].mxu1 }
 0x425   : > { %v2069_v22 = vpop.f32.mrb[43].mxu1 }
 0x446   : > { %v2380_v23 = vpop.f32.mrb[24].mxu1 }
 0x447   : > { %v2429_v25 = vadd.f32 %v2422_v39, %v2380_v23  ;;  %v2382_v29 = vpop.f32.mrb[25].mxu1 }
 0x448   : > { %v2430_v28 = vadd.f32 %v2426_v35, %v2382_v29  ;;  %v2384_v12 = vpop.f32.mrb[26].mxu1 }
 0x449   : > { %4317 = vtanh.f32 %v2429_v25  ;;  %v2431_v33 = vadd.f32 %v2422_v39, %v2384_v12  ;;  %v2386_v27 = vpop.f32.mrb[27].mxu1 }
 0x44a   : > { %4319 = vtanh.f32 %v2430_v28  ;;  %v2432_v26 = vadd.f32 %v2426_v35, %v2386_v27 }
 0x44b   : > { %4321 = vtanh.f32 %v2431_v33 }
 0x44c   : > { %4323 = vtanh.f32 %v2432_v26 }
 0x44e   : > { %v2390_v11 = vpop.f32.mrb[28].mxu1 }
 0x44f   : > { %v2433_v34 = vadd.f32 %v2422_v39, %v2390_v11  ;;  %v2392_v4 = vpop.f32.mrb[29].mxu1 }
 0x450   : > { %v2434_v8 = vadd.f32 %v2426_v35, %v2392_v4  ;;  %v2394_v45 = vpop.f32.mrb[30].mxu1 }
 0x451   : > { %4325 = vtanh.f32 %v2433_v34  ;;  %v2435_v44 = vadd.f32 %v2422_v39, %v2394_v45  ;;  %v2396_v47 = vpop.f32.mrb[31].mxu1 }
 0x452   : > { %4327 = vtanh.f32 %v2434_v8  ;;  %v2436_v40 = vadd.f32 %v2426_v35, %v2396_v47 }
 0x453   : > { %v4318_v42 = vpop.eup %4317  ;;  %4329 = vtanh.f32 %v2435_v44 }
 0x454   : > { %v4320_v55 = vpop.eup %4319  ;;  %4331 = vtanh.f32 %v2436_v40  ;;  %v2459_v51 = vrot.slane %v4318_v42, 1 }
 0x455   : > { %v4322_v57 = vpop.eup %4321  ;;  %v2462_v3 = vrot.slane %v4320_v55, 1 }
 0x456   : > { %v4324_v31 = vpop.eup %4323  ;;  %v2400_v38 = vpop.f32.mrb[44].mxu1  ;;  %v2460_v49 = vrot.slane %v4322_v57, 1 }
 0x457   : > { %v2415_v20 = vadd.f32 %v2400_v38, %v2079_v62  ;;  %v2402_v30 = vpop.f32.mrb[45].mxu1  ;;  %v2463_v58 = vrot.slane %v4324_v31, 1 }
 0x458   : > { %v2416_v9 = vadd.f32 %v2402_v30, %v2080_v7  ;;  %v2404_v53 = vpop.f32.mrb[46].mxu1  ;;  %v2461_v48 = vsel %vm819_vm1, %v2459_v51, %v2460_v49 }
 0x459   : > { %v2437_v15 = vadd.f32 %v2422_v39, %v2415_v20  ;;  %v2405_v16 = vpop.f32.mrb[47].mxu1  ;;  %v2464_v37 = vsel %vm819_vm1, %v2462_v3, %v2463_v58  ;;  %v2487_v2 = vmax.f32 %v4318_v42, %v2461_v48 }
 0x45a   : > { %v2438_v43 = vadd.f32 %v2426_v35, %v2416_v9  ;;  %v2488_v14 = vmax.f32 %v4320_v55, %v2464_v37 }
 0x45b   : > { %v4326_v32 = vpop.eup %4325  ;;  %4333 = vtanh.f32 %v2437_v15 }
 0x45c   : > { %v4328_v56 = vpop.eup %4327  ;;  %4335 = vtanh.f32 %v2438_v43  ;;  %v3968_v0 = vpack.i.bf16 %v2488_v14, %v2487_v2  ;;  %v2465_v54 = vrot.slane %v4326_v32, 1 }
 0x45d   : > { %v4330_v36 = vpop.eup %4329  ;;  %v2467_v59 = vrot.slane %v4328_v56, 1 }
 0x45e   : > { %v4332_v5 = vpop.eup %4331  ;;  %3969 = vrot.lane.b32.xlu1 %v3968_v0, %s4403_s16  ;;  %v2466_v10 = vsel %vm819_vm1, %v2460_v49, %v2465_v54  ;;  %v2469_v46 = vrot.slane %v4330_v36, 1 }
 0x45f   : > { %v2468_v63 = vsel %vm819_vm1, %v2463_v58, %v2467_v59  ;;  %v2489_v41 = vmax.f32 %v4322_v57, %v2466_v10  ;;  %v2471_v18 = vrot.slane %v4332_v5, 1 }
 0x460   : > { %v2490_v21 = vmax.f32 %v4324_v31, %v2468_v63  ;;  %v2470_v50 = vsel %vm819_vm1, %v2465_v54, %v2469_v46  ;;  %v4223_v63 = vld [vmem:[%s5732_s7 + $0x50] sm:$0xff]  }
 0x461   : > { %v2472_v6 = vsel %vm819_vm1, %v2467_v59, %v2471_v18  ;;  %v2491_v24 = vmax.f32 %v4326_v32, %v2470_v50  ;;  %v4227_v50 = vld [vmem:[%s5732_s7 + $0x70] sm:$0xff]  }
 0x462   : > { %v3973_v61 = vpack.i.bf16 %v2490_v21, %v2489_v41  ;;  %v2492_v62 = vmax.f32 %v4328_v56, %v2472_v6  ;;  %v4228_v6 = vld [vmem:[%s5732_s7 + $0x78] sm:$0xff]  }
 0x464   : > { %3974 = vrot.lane.b32.xlu0 %v3973_v61, %s4403_s16  ;;  %v3978_v17 = vpack.i.bf16 %v2492_v62, %v2491_v24  ;;  %v4230_v61 = vld [vmem:[%s5732_s7 + $0x88] sm:$0xff]  }
 0x465   : > { %v4334_v7 = vpop.eup %4333 }
 0x466   : > { %v4336_v1 = vpop.eup %4335  ;;  %3979 = vrot.lane.b32.xlu1 %v3978_v17, %s4403_s16  ;;  %v2473_v22 = vrot.slane %v4334_v7, 1  ;;  %v4232_v17 = vld [vmem:[%s5732_s7 + $0x98] sm:$0xff]  }
 0x467   : > { %v2475_v19 = vrot.slane %v4336_v1, 1 }
 0x468   : > { %v2495_v39 = vmax.f32 %v4334_v7, %v2473_v22  ;;  %v2474_v35 = vsel %vm819_vm1, %v2469_v46, %v2473_v22  ;;  %v2558_v46 = vld [vmem:[%s5731_s6] sm:$0xf]  ;;  %v2765_v7 = vand.u32 %v4232_v17, %v5022_v13 }
 0x469   : > { %v2496_v23 = vmax.f32 %v4336_v1, %v2475_v19  ;;  %v2476_v25 = vsel %vm819_vm1, %v2471_v18, %v2475_v19  ;;  %v2493_v29 = vmax.f32 %v4330_v36, %v2474_v35  ;;  %v4225_v18 = vld [vmem:[%s5732_s7 + $0x60] sm:$0xff]  }
 0x46a   : > { %v2494_v28 = vmax.f32 %v4332_v5, %v2476_v25 }
 0x46b   : > { %v3988_v12 = vpack.i.bf16 %v2496_v23, %v2495_v39 }
 0x46c   : > { %v3983_v33 = vpack.i.bf16 %v2494_v28, %v2493_v29 }
 0x46d   : > { %3989 = vrot.lane.b32.xlu1 %v3988_v12, %s4403_s16 }
 0x46e   : > { %3984 = vrot.lane.b32.xlu0 %v3983_v33, %s4403_s16  ;;  %s4345_s16 = scalar_lea.vmem %s4344_s19, 256 }
 0x46f   : > { %p4347_p1 = scmp.lt.s32.totalorder %s4345_s16, %s4339_s24 }
 0x471   : > { %p4348_p2 = por %p4347_p1, %p4346_p0 }
 0x473   : > { %p4349_p3 = pnand %p4348_p2, %p4342_p13 }
 0x4d0   : > { %v3970_v27 = vpop.permute.xlu1 %3969 }
 0x4d1   : > { %v3972_v26 = vunpack.i.h.bf16 %v3970_v27  ;;  %v3971_v11 = vunpack.i.l.bf16 %v3970_v27 }
 0x4d3   : > { %v2527_v4 = vsel %vm1000_vm2, %v3971_v11, %v3972_v26  ;;  %v2543_v44 = vmax.f32 %v2488_v14, %v3972_v26  ;;  %v4234_v26 = vld [vmem:[%s5732_s7 + $0x8] sm:$0xff]   ;;  %v4235_v11 = vld [vmem:[%s5732_s7 + $0x10] sm:$0xff]  }
 0x4d4   : > { %v2542_v42 = vmax.f32 %v2487_v2, %v2527_v4  ;;  %v4237_v4 = vld [vmem:[%s5732_s7 + $0x20] sm:$0xff]  }
 0x4d6   : > { %v3975_v34 = vpop.permute.xlu0 %3974 }
 0x4d7   : > { %v3977_v8 = vunpack.i.h.bf16 %v3975_v34  ;;  %v3976_v45 = vunpack.i.l.bf16 %v3975_v34  ;;  %v4236_v34 = vld [vmem:[%s5732_s7 + $0x18] sm:$0xff]  }
 0x4d8   : > { %v3980_v57 = vpop.permute.xlu1 %3979 }
 0x4d9   : > { %v2545_v47 = vmax.f32 %v2490_v21, %v3977_v8  ;;  %v2528_v40 = vsel %vm1000_vm2, %v3976_v45, %v3977_v8  ;;  %v3982_v51 = vunpack.i.h.bf16 %v3980_v57  ;;  %v3981_v49 = vunpack.i.l.bf16 %v3980_v57  ;;  %v4226_v21 = vld [vmem:[%s5732_s7 + $0x68] sm:$0xff]   ;;  %v4239_v45 = vld [vmem:[%s5732_s7 + $0x30] sm:$0xff]  }
 0x4da   : > { %v2544_v55 = vmax.f32 %v2489_v41, %v2528_v40  ;;  %v4224_v41 = vld [vmem:[%s5732_s7 + $0x58] sm:$0xff]   ;;  %v4238_v8 = vld [vmem:[%s5732_s7 + $0x28] sm:$0xff]  }
 0x4db   : > { %v5439_v31 = vpack.c.bf16 %v2545_v47, %v2543_v44  ;;  %v2529_v9 = vsel %vm1000_vm2, %v3981_v49, %v3982_v51  ;;  %v2547_v37 = vmax.f32 %v2492_v62, %v3982_v51  ;;  %v4231_v62 = vld [vmem:[%s5732_s7 + $0x90] sm:$0xff]   ;;  %v4240_v44 = vld [vmem:[%s5732_s7 + $0x38] sm:$0xff]   ;;  %v4241_v47 = vld [vmem:[%s5732_s7 + $0x40] sm:$0xff]  }
 0x4dc   : > { %v5441_v38 = vpack.c.bf16 %v2544_v55, %v2542_v42  ;;  %v2546_v32 = vmax.f32 %v2491_v24, %v2529_v9  ;;  %v4229_v24 = vld [vmem:[%s5732_s7 + $0x80] sm:$0xff]   ;;  %v4242_v40 = vld [vmem:[%s5732_s7 + $0x48] sm:$0xff]  }
 0x4dd   : > { %2569 = vmatprep.subr.bf16.mxu0 %v5439_v31  ;;  %v2870_v42 = vand.u32 %v4242_v40, %v5022_v13  ;;  %v3748_v57 = vld [vmem:[%s5731_s6 + $0x8] sm:$0xf]  ;;  %v3781_v51 = vld [vmem:[%s5731_s6 + $0xc] sm:$0xf]  ;;  %v4248_v9 = vld [vmem:[%s5732_s7 + $0xc0] sm:$0xff]  }
 0x4de   : > { %2570 = vmatpush1.bf16.msra.mxu0 %v5441_v38  ;;  %v4244_v49 = vld [vmem:[%s5732_s7 + $0xa8] sm:$0xff]  }
 0x4df   : > { %v3990_v20 = vpop.permute.xlu1 %3989 }
 0x4e0   : > { %v3992_v30 = vunpack.i.h.bf16 %v3990_v20  ;;  %v3991_v3 = vunpack.i.l.bf16 %v3990_v20  ;;  %v3985_v58 = vpop.permute.xlu0 %3984  ;;  %v4249_v20 = vld [vmem:[%s5732_s7 + $0xf8] sm:$0xff]  }
 0x4e1   : > { %v3987_v53 = vunpack.i.h.bf16 %v3985_v58  ;;  %v3986_v48 = vunpack.i.l.bf16 %v3985_v58  ;;  %v4246_v58 = vld [vmem:[%s5732_s7 + $0xb8] sm:$0xff]  }
 0x4e2   : > { %v2551_v15 = vmax.f32 %v2496_v23, %v3992_v30  ;;  %v2531_v16 = vsel %vm1000_vm2, %v3991_v3, %v3992_v30  ;;  %v4245_v30 = vld [vmem:[%s5732_s7 + $0xb0] sm:$0xff]   ;;  %v4251_v3 = vld [vmem:[%s5732_s7 + $0x100] sm:$0xff]  }
 0x4e3   : > { %v2550_v2 = vmax.f32 %v2495_v39, %v2531_v16  ;;  %v2549_v43 = vmax.f32 %v2494_v28, %v3987_v53  ;;  %v2530_v14 = vsel %vm1000_vm2, %v3986_v48, %v3987_v53  ;;  %v4250_v53 = vld [vmem:[%s5732_s7 + $0xc8] sm:$0xff]   ;;  %v4252_v48 = vld [vmem:[%s5732_s7 + $0xd0] sm:$0xff]   ;;  %v4254_v16 = vld [vmem:[%s5732_s7 + $0xd8] sm:$0xff]  }
 0x4e4   : > { %v2557_v56 = vpack.c.bf16 %v2551_v15, %v2551_v15  ;;  %v2548_v0 = vmax.f32 %v2493_v29, %v2530_v14  ;;  %v4233_v29 = vld [vmem:[%s5732_s7] sm:$0xff]   ;;  %v4253_v15 = vld [vmem:[%s5732_s7 + $0x108] sm:$0xff]  }
 0x4e5   : > { %v5448_v54 = vpack.c.bf16 %v2549_v43, %v2547_v37  ;;  %v2556_v59 = vpack.c.bf16 %v2550_v2, %v2550_v2  ;;  %v4255_v37 = vld [vmem:[%s5732_s7 + $0x110] sm:$0xff]   ;;  %v4256_v2 = vld [vmem:[%s5732_s7 + $0xe0] sm:$0xff]   ;;  %v4257_v43 = vld [vmem:[%s5732_s7 + $0x118] sm:$0xff]  }
 0x4e6   : > { %v5451_v36 = vand.u32 %v2557_v56, %v4857_v52  ;;  %v5453_v5 = vpack.c.bf16 %v2548_v0, %v2546_v32  ;;  %v4258_v14 = vld [vmem:[%s5732_s7 + $0xe8] sm:$0xff]   ;;  %v4259_v56 = vld [vmem:[%s5732_s7 + $0x120] sm:$0xff]  }
 0x4e7   : > { %2571 = vmatprep.subr.bf16.mxu0 %v5448_v54  ;;  %v5459_v10 = vand.u32 %v2556_v59, %v4857_v52  ;;  %v3704_v52 = vld [vmem:[%s5731_s6 + $0x4] sm:$0xf]  ;;  %v3044_v32 = vand.u32 %v4258_v14, %v5022_v13  ;;  %v4260_v0 = vld [vmem:[%s5732_s7 + $0x128] sm:$0xff]  }
 0x4e8   : > { %2572 = vmatpush1.bf16.msra.mxu0 %v5453_v5 }
 0x4e9   : > { %2573 = vmatprep.subr.bf16.mxu0 %v5451_v36 }
 0x4ec   : > { %2574 = vmatpush1.bf16.msra.mxu0 %v5459_v10 }
 0x4ed   : > { %2637 = vmatprep.subr.bf16.mxu0 %v5439_v31 }
 0x4ef   : > { %3703 = vmatmul.mubr.msk.bf16.vlgmr.msra.gmra.mrb[52].mxu0 %vm2559_vm8, %v2558_v46 }
 0x4f0   : > { %2638 = vmatpush1.bf16.msra.mxu0 %v5441_v38  ;;  %2669 = vmatprep.mubr.bf16.mxu0 %v4404_v60 }
 0x4f1   : > { %2639 = vmatprep.subr.bf16.mxu0 %v5448_v54 }
 0x4f4   : > { %2640 = vmatpush1.bf16.msra.mxu0 %v5453_v5 }
 0x4f5   : > { %2641 = vmatprep.subr.bf16.mxu0 %v5451_v36 }
 0x4f8   : > { %2642 = vmatpush1.bf16.msra.mxu0 %v5459_v10 }
 0x4f9   : > { %2767 = vmatprep.subr.bf16.mxu0 %v4404_v60 }
 0x4fb   : > { %3705 = vmatmul.mubr.msk.bf16.vlgmr.msra.gmra.mrb[56].mxu0 %vm2559_vm8, %v3704_v52 }
 0x4fc   : > { %2768 = vmatpush1.bf16.msra.mxu0 %v4223_v63 }
 0x4fd   : > { %2769 = vmatprep.subr.bf16.mxu0 %v4404_v60 }
 0x500   : > { %2770 = vmatpush1.bf16.msra.mxu0 %v4224_v41 }
 0x501   : > { %2771 = vmatprep.subr.bf16.mxu0 %v4404_v60 }
 0x504   : > { %2772 = vmatpush1.bf16.msra.mxu0 %v4225_v18 }
 0x505   : > { %2773 = vmatprep.subr.bf16.mxu0 %v4404_v60 }
 0x508   : > { %2774 = vmatpush1.bf16.msra.mxu0 %v4226_v21 }
 0x509   : > { %2775 = vmatprep.subr.bf16.mxu0 %v4404_v60 }
 0x50c   : > { %2776 = vmatpush1.bf16.msra.mxu0 %v4227_v50 }
 0x50d   : > { %2777 = vmatprep.subr.bf16.mxu0 %v4404_v60 }
 0x510   : > { %2778 = vmatpush1.bf16.msra.mxu0 %v4228_v6 }
 0x511   : > { %2779 = vmatprep.subr.bf16.mxu0 %v4404_v60 }
 0x514   : > { %2780 = vmatpush1.bf16.msra.mxu0 %v4229_v24 }
 0x515   : > { %2781 = vmatprep.subr.bf16.mxu0 %v4404_v60 }
 0x518   : > { %2782 = vmatpush1.bf16.msra.mxu0 %v4230_v61 }
 0x519   : > { %2783 = vmatprep.subr.bf16.mxu0 %v4404_v60 }
 0x51c   : > { %2784 = vmatpush1.bf16.msra.mxu0 %v4231_v62 }
 0x51d   : > { %2785 = vmatprep.subr.bf16.mxu0 %v4404_v60 }
 0x520   : > { %2786 = vmatpush1.bf16.msra.mxu0 %v2765_v7 }
 0x521   : > { %2872 = vmatprep.subr.bf16.mxu0 %v4404_v60 }
 0x5c2   : > { %v2603_v1 = vpop.f32.mrb[52].mxu0 }
 0x5c3   : > { %v2605_v22 = vpop.f32.mrb[53].mxu0  ;;  %v2610_v55 = vpack.c.bf16 %v2603_v1, %v2603_v1 }
 0x5c4   : > { %v2607_v19 = vpop.f32.mrb[54].mxu0  ;;  %v2611_v27 = vpack.c.bf16 %v2605_v22, %v2605_v22 }
 0x5c5   : > { %v2608_v39 = vpop.f32.mrb[55].mxu0 }
 0x5ce   : > { %v2671_v35 = vpop.f32.mrb[56].mxu0 }
 0x5cf   : > { %v2673_v23 = vpop.f32.mrb[57].mxu0  ;;  %v2678_v12 = vpack.c.bf16 %v2671_v35, %v2671_v35  ;;  %v4263_v35 = vld [vmem:[%s5734_s9] sm:$0xff]  }
 0x5d0   : > { %v2679_v25 = vpack.c.bf16 %v2673_v23, %v2673_v23  ;;  %v2675_v28 = vpop.f32.mrb[58].mxu0  ;;  %v4406_v23 = vmov 0.0  }
 0x5d1   : > { %v2676_v33 = vpop.f32.mrb[59].mxu0 }
 0x5d2   : > { %3736 = vmatprep.mubr.msk.bf16.mxu0 %vm2760_vm9, %v2679_v25  ;;  %v4264_v25 = vld [vmem:[%s5734_s9 + $0x8] sm:$0xff]  }
 0x5d3   : > { %2800 = vmatmul.mubr.bf16.vlgmr.msra.gmra.mrb[60].mxu0 %v2678_v12 }
 0x5d4   : > { %2873 = vmatpush1.bf16.msra.mxu0 %v4233_v29  ;;  %3747 = vmatprep.mubr.msk.bf16.mxu0 %vm2760_vm9, %v2611_v27 }
 0x5d5   : > { %2874 = vmatprep.subr.bf16.mxu0 %v4404_v60 }
 0x5d8   : > { %2875 = vmatpush1.bf16.msra.mxu0 %v4234_v26 }
 0x5d9   : > { %2876 = vmatprep.subr.bf16.mxu0 %v4404_v60 }
 0x5dc   : > { %2877 = vmatpush1.bf16.msra.mxu0 %v4235_v11  ;;  %v3814_v11 = vld [vmem:[%s5733_s8] ss:$0 sm:$0xff] }
 0x5dd   : > { %2878 = vmatprep.subr.bf16.mxu0 %v4404_v60 }
 0x5e0   : > { %2879 = vmatpush1.bf16.msra.mxu0 %v4236_v34 }
 0x5e1   : > { %2880 = vmatprep.subr.bf16.mxu0 %v4404_v60 }
 0x5e4   : > { %2881 = vmatpush1.bf16.msra.mxu0 %v4237_v4 }
 0x5e5   : > { %2882 = vmatprep.subr.bf16.mxu0 %v4404_v60 }
 0x5e8   : > { %2883 = vmatpush1.bf16.msra.mxu0 %v4238_v8 }
 0x5e9   : > { %2884 = vmatprep.subr.bf16.mxu0 %v4404_v60 }
 0x5ec   : > { %2885 = vmatpush1.bf16.msra.mxu0 %v4239_v45 }
 0x5ed   : > { %2886 = vmatprep.subr.bf16.mxu0 %v4404_v60 }
 0x5f0   : > { %2887 = vmatpush1.bf16.msra.mxu0 %v4240_v44 }
 0x5f1   : > { %2888 = vmatprep.subr.bf16.mxu0 %v4404_v60 }
 0x5f4   : > { %2889 = vmatpush1.bf16.msra.mxu0 %v4241_v47 }
 0x5f5   : > { %2890 = vmatprep.subr.bf16.mxu0 %v4404_v60 }
 0x5f8   : > { %2891 = vmatpush1.bf16.msra.mxu0 %v2870_v42  ;;  %v3815_v42 = vld [vmem:[%s5735_s10] ss:$0 sm:$0xff] }
 0x5f9   : > { %2917 = vmatprep.subr.bf16.mxu0 %v5439_v31 }
 0x5fb   : > { %2905 = vmatmul.mubr.bf16.vlgmr.msra.gmra.mrb[64].mxu0 %v2610_v55 }
 0x5fc   : > { %2918 = vmatpush1.bf16.msra.mxu0 %v5441_v38  ;;  %2949 = vmatprep.mubr.bf16.mxu0 %v4404_v60 }
 0x5fd   : > { %2919 = vmatprep.subr.bf16.mxu0 %v5448_v54 }
 0x600   : > { %2920 = vmatpush1.bf16.msra.mxu0 %v5453_v5 }
 0x601   : > { %2921 = vmatprep.subr.bf16.mxu0 %v5451_v36 }
 0x604   : > { %2922 = vmatpush1.bf16.msra.mxu0 %v5459_v10 }
 0x605   : > { %3092 = vmatprep.subr.bf16.mxu0 %v5439_v31  ;;  %v4243_v31 = vld [vmem:[%s5732_s7 + $0xa0] sm:$0xff]  }
 0x606   : > { %3047 = vmatpush1.bf16.msra.mxu1 %v4243_v31 }
 0x607   : > { %3749 = vmatmul.mubr.msk.bf16.vlgmr.msra.gmra.mrb[68].mxu0 %vm2559_vm8, %v3748_v57  ;;  %3048 = vmatprep.subr.bf16.mxu1 %v4404_v60 }
 0x608   : > { %3093 = vmatpush1.bf16.msra.mxu0 %v5441_v38  ;;  %3124 = vmatprep.mubr.bf16.mxu0 %v4404_v60  ;;  %v4247_v38 = vld [vmem:[%s5732_s7 + $0xf0] sm:$0xff]  }
 0x609   : > { %3094 = vmatprep.subr.bf16.mxu0 %v5448_v54  ;;  %v4261_v54 = vld [vmem:[%s5732_s7 + $0x130] sm:$0xff]  }
 0x60a   : > { %3049 = vmatpush1.bf16.msra.mxu1 %v4244_v49 }
 0x60b   : > { %3050 = vmatprep.subr.bf16.mxu1 %v4404_v60 }
 0x60c   : > { %3095 = vmatpush1.bf16.msra.mxu0 %v5453_v5 }
 0x60d   : > { %3096 = vmatprep.subr.bf16.mxu0 %v5451_v36  ;;  %v4262_v36 = vld [vmem:[%s5732_s7 + $0x138] sm:$0xff]  }
 0x60e   : > { %3051 = vmatpush1.bf16.msra.mxu1 %v4245_v30  ;;  %v3219_v59 = vand.u32 %v4262_v36, %v5022_v13 }
 0x60f   : > { %3052 = vmatprep.subr.bf16.mxu1 %v4404_v60 }
 0x610   : > { %3097 = vmatpush1.bf16.msra.mxu0 %v5459_v10 }
 0x611   : > { %3221 = vmatprep.subr.bf16.mxu0 %v4404_v60 }
 0x612   : > { %3053 = vmatpush1.bf16.msra.mxu1 %v4246_v58 }
 0x613   : > { %3782 = vmatmul.mubr.msk.bf16.vlgmr.msra.gmra.mrb[72].mxu0 %vm2559_vm8, %v3781_v51  ;;  %3054 = vmatprep.subr.bf16.mxu1 %v4404_v60 }
 0x614   : > { %3222 = vmatpush1.bf16.msra.mxu0 %v4247_v38 }
 0x615   : > { %3223 = vmatprep.subr.bf16.mxu0 %v4404_v60 }
 0x616   : > { %3055 = vmatpush1.bf16.msra.mxu1 %v4248_v9 }
 0x617   : > { %3056 = vmatprep.subr.bf16.mxu1 %v4404_v60 }
 0x618   : > { %3224 = vmatpush1.bf16.msra.mxu0 %v4249_v20 }
 0x619   : > { %3225 = vmatprep.subr.bf16.mxu0 %v4404_v60 }
 0x61a   : > { %3057 = vmatpush1.bf16.msra.mxu1 %v4250_v53 }
 0x61b   : > { %3058 = vmatprep.subr.bf16.mxu1 %v4404_v60 }
 0x61c   : > { %3226 = vmatpush1.bf16.msra.mxu0 %v4251_v3 }
 0x61d   : > { %3227 = vmatprep.subr.bf16.mxu0 %v4404_v60 }
 0x61e   : > { %3059 = vmatpush1.bf16.msra.mxu1 %v4252_v48 }
 0x61f   : > { %3060 = vmatprep.subr.bf16.mxu1 %v4404_v60 }
 0x620   : > { %3228 = vmatpush1.bf16.msra.mxu0 %v4253_v15 }
 0x621   : > { %3229 = vmatprep.subr.bf16.mxu0 %v4404_v60 }
 0x622   : > { %3061 = vmatpush1.bf16.msra.mxu1 %v4254_v16 }
 0x623   : > { %3062 = vmatprep.subr.bf16.mxu1 %v4404_v60 }
 0x624   : > { %3230 = vmatpush1.bf16.msra.mxu0 %v4255_v37 }
 0x625   : > { %3231 = vmatprep.subr.bf16.mxu0 %v4404_v60 }
 0x626   : > { %3063 = vmatpush1.bf16.msra.mxu1 %v4256_v2 }
 0x627   : > { %3064 = vmatprep.subr.bf16.mxu1 %v4404_v60 }
 0x628   : > { %3232 = vmatpush1.bf16.msra.mxu0 %v4257_v43 }
 0x629   : > { %3233 = vmatprep.subr.bf16.mxu0 %v4404_v60 }
 0x62a   : > { %3065 = vmatpush1.bf16.msra.mxu1 %v3044_v32 }
 0x62b   : > { %3827 = vmatprep.subr.bf16.mxu1 %v4406_v23 }
 0x62c   : > { %3234 = vmatpush1.bf16.msra.mxu0 %v4259_v56 }
 0x62d   : > { %3235 = vmatprep.subr.bf16.mxu0 %v4404_v60 }
 0x630   : > { %3236 = vmatpush1.bf16.msra.mxu0 %v4260_v0 }
 0x631   : > { %3237 = vmatprep.subr.bf16.mxu0 %v4404_v60 }
 0x634   : > { %3238 = vmatpush1.bf16.msra.mxu0 %v4261_v54 }
 0x635   : > { %3239 = vmatprep.subr.bf16.mxu0 %v4404_v60 }
 0x638   : > { %3240 = vmatpush1.bf16.msra.mxu0 %v3219_v59 }
 0x6a6   : > { %v2801_v5 = vpop.f32.mrb[60].mxu0 }
 0x6a7   : > { %v2803_v10 = vpop.f32.mrb[61].mxu0 }
 0x6a8   : > { %v2804_v46 = vpop.f32.mrb[62].mxu0 }
 0x6a9   : > { %v2805_v52 = vpop.f32.mrb[63].mxu0 }
 0x6ce   : > { %v2906_v63 = vpop.f32.mrb[64].mxu0 }
 0x6cf   : > { %v2907_v41 = vadd.f32 %v2906_v63, %v2801_v5  ;;  %v2908_v18 = vpop.f32.mrb[65].mxu0 }
 0x6d0   : > { %v2909_v21 = vpop.f32.mrb[66].mxu0 }
 0x6d1   : > { %v2910_v50 = vpop.f32.mrb[67].mxu0 }
 0x6da   : > { %v2951_v6 = vpop.f32.mrb[68].mxu0 }
 0x6db   : > { %v2958_v24 = vpack.c.bf16 %v2951_v6, %v2951_v6  ;;  %v2953_v61 = vpop.f32.mrb[69].mxu0 }
 0x6dc   : > { %v2959_v62 = vpack.c.bf16 %v2953_v61, %v2953_v61  ;;  %v2955_v17 = vpop.f32.mrb[70].mxu0 }
 0x6dd   : > { %v2956_v7 = vpop.f32.mrb[71].mxu0 }
 0x6de   : > { %3780 = vmatprep.mubr.msk.bf16.mxu1 %vm2760_vm9, %v2959_v62 }
 0x6df   : > { %3079 = vmatmul.mubr.bf16.vlgmr.msra.gmra.mrb[48].mxu1 %v2958_v24 }
 0x6e0   : > { %3828 = vmatpush3.bf16.msra.mxu1 %v4263_v35  ;;  %3831 = vmatprep.mubr.msk.bf16.mxu1 %vm4407_vm10, %v4406_v23 }
 0x6e1   : > { %3829 = vmatprep.subr.bf16.mxu1 %v4406_v23 }
 0x6e4   : > { %3830 = vmatpush3.bf16.msra.mxu1 %v4264_v25 }
 0x6e6   : > { %v3126_v60 = vpop.f32.mrb[72].mxu0 }
 0x6e7   : > { %v3128_v13 = vpop.f32.mrb[73].mxu0  ;;  %v3133_v19 = vpack.c.bf16 %v3126_v60, %v3126_v60 }
 0x6e8   : > { %v3134_v1 = vpack.c.bf16 %v3128_v13, %v3128_v13  ;;  %v3130_v22 = vpop.f32.mrb[74].mxu0 }
 0x6e9   : > { %v3131_v39 = vpop.f32.mrb[75].mxu0 }
 0x6ea   : > { %3813 = vmatprep.mubr.msk.bf16.mxu0 %vm2760_vm9, %v3134_v1 }
 0x6eb   : > { %3254 = vmatmul.mubr.bf16.vlgmr.msra.gmra.mrb[76].mxu0 %v3133_v19 }
 0x7b2   : > { %v3080_v29 = vpop.f32.mrb[48].mxu1 }
 0x7b3   : > { %v3086_v28 = vadd.f32 %v3080_v29, %v2907_v41  ;;  %v3082_v12 = vpop.f32.mrb[49].mxu1 }
 0x7b4   : > { %v3083_v33 = vpop.f32.mrb[50].mxu1 }
 0x7b5   : > { %v3084_v27 = vpop.f32.mrb[51].mxu1 }
 0x7be   : > { %v3255_v26 = vpop.f32.mrb[76].mxu0 }
 0x7bf   : > { %v3261_v34 = vadd.f32 %v3255_v26, %v3086_v28  ;;  %v3257_v4 = vpop.f32.mrb[77].mxu0 }
 0x7c0   : > { %v3258_v8 = vpop.f32.mrb[78].mxu0 }
 0x7c1   : > { %v3269_v45 = vadd.f32 %v3814_v11, %v3261_v34  ;;  %v3259_v44 = vpop.f32.mrb[79].mxu0 }
 0x7c3   : > { %4337 = vtanh.f32 %v3269_v45 }
 0x7cd   : > { %v4338_v47 = vpop.eup %4337 }
 0x7ce   : > { %v3271_v40 = vpack.c.bf16 %v4338_v47, %v4338_v47 }
 0x7d0   : > { %3832 = vmatmul.mubr.msk.bf16.vlgmr.msra.gmra.mrb[52].mxu1 %vm3295_vm11, %v3271_v40 }
 0x8a3   : > { %v3333_v55 = vpop.f32.mrb[52].mxu1 }
 0x8a4   : > { %v3334_v57 = vadd.f32 %v3815_v42, %v3333_v55  ;;  %v3833_v51 = vpop.f32.mrb[53].mxu1 }
 0x8a5   : > { %v3336_v31 = vpop.f32.mrb[54].mxu1 }
 0x8a6   : > { %v3834_v38 = vpop.f32.mrb[55].mxu1  ;;  %3340 = vst.msk [vmem:[%s382_s12] sm:$0xff] %vm3339_vm12, %v3334_v57 }
 0x8a7   : > { %4352 = shalt.err (!%p4349_p3)
}
 0x8a8   : > { %s4353_s30 = scalar_lea.hbm %s5683_s14, 128  ;;  %s4357_s12 = scalar_lea.hbm %s5736_s11, 256 }
 0x8a9   : > { %p4354_p4 = scmp.ne.s32.totalorder %s5683_s14, %s4353_s30  ;;  %p4358_p9 = scmp.lt.u32.totalorder %s5683_s14, %s5736_s11 }
 0x8aa   : > { %p4359_p10 = scmp.lt.u32.totalorder %s4357_s12, %s4353_s30  ;;  %p4361_p12 = scmp.lt.u32.totalorder %s4353_s30, %s5683_s14 }
 0x8ab   : > { %p4355_p7 = pnand %p4354_p4, %p4507_p5 }
 0x8ac   : > { %p4360_p11 = por %p4359_p10, %p4358_p9 }
 0x8ad   : > { %p4356_p8 = pneg %p4355_p7 }
 0x8ae   : > { %p4362_p13 = por %p4361_p12, %p4360_p11 }
 0x8b0   : > { %p4363_p0 = pnand %p4362_p13, %p4356_p8 }
 0x8b2   : > { %4366 = shalt.err (!%p4363_p0)
}
 0x8b3   : > { %3859 = dma.vmem_to_hbm [thread:$0]  (%p4507_p5), %s5685_s13, 128, %s5683_s14, %s3342_s21  }
 0x8b4 PF: > { %p3865_p1 = scmp.ge.s32.totalorder %s4401_s20, 2  ;;  %s3367_s24 = sand.u32 1, %s4389_s17  }
 0x8b5   : > { %s3368_s25 = scalar_lea.sflag [#allocation3], %s3367_s24 }
 0x8b6   : > { %p3862_p2 = pnand %p3865_p1, %p4511_p6 }
 0x8b8   : > { %4384 = dma.done.wait (!%p3862_p2), %s3368_s25, 128  }
 0x8b9   : > { %4386 = vsyncadd (!%p3862_p2), %s3368_s25, 4294967168  ;;  %s5742_s19 = sld [smem:[#allocation5_spill]]  ;;  %s5743_s16 = sld [smem:[#allocation6_spill]] }
 0x8ba   : > { %p21_p3 = scmp.ge.s32.totalorder %s4494_s23, 4   ;;  %s5744_s17 = smov %s4393_s18 }
 0x8bb   : > { %s5747_s20 = smov %s4494_s23 }
 0x8bc   :  { %23 = sbr.rel (!%p21_p3) target bundleno = 3 (0x3), region = 111 }
 0x8bf   : > { %s5745_s18 = smov %s5742_s19  ;;  %s5746_s19 = smov %s5743_s16 }
 0x8c3   :  { %3373 = vsyncpa [#allocation3], 1 }
 0x8c4   :  { %3375 = vsyncpa [#allocation3 + $0x1], 1 }

</bundles_post_ra>
